<compile_context>
chip_gen: v7x
topology: tpu7x:2x2x1
jax: 0.10.0
libtpu: 0.0.40
codegen_flags: <defaults>
</compile_context>

<pallas_src>
import functools

import jax
import jax.numpy as jnp
from jax import lax
from jax.experimental import pallas as pl
from jax.experimental.pallas import tpu as pltpu

# ---------------- small "backbone" config ----------------
VOCAB = 100
HIDDEN = 32              # backbone.config.hidden_size
N_HEADS = 2
HEAD_DIM = HIDDEN // N_HEADS
N_LAYERS = 2
INTERMEDIATE = 64
MAX_POS = 16
N_OUTPUT = 3             # n_output_normal
LN_EPS_BACKBONE = 1e-12  # BERT layernorm eps
LN_EPS_HEAD = 1e-5       # torch.nn.LayerNorm default eps
NEG_BIG = -1e9

# ---------------- packed vector-slab row layout (one (N_VEC_ROWS, 128) f32 input) ----------------
VEC_WIDTH = 128
ROW_EMB_LN_G = 0
ROW_EMB_LN_B = 1
ROW_CLS_LN_G = 2
ROW_CLS_LN_B = 3
ROW_CLS_B = 4
ROW_CLS_WT = 5                                  # rows 5..7 : cls_w^T  (N_OUTPUT, HIDDEN)
ROW_LAYER_BASE = ROW_CLS_WT + N_OUTPUT          # 8
ROWS_PER_LAYER = 8
(LROW_BQKV, LROW_BO, LROW_LN1G, LROW_LN1B,
 LROW_BI, LROW_BO2, LROW_LN2G, LROW_LN2B) = range(ROWS_PER_LAYER)
N_VEC_ROWS = ROW_LAYER_BASE + ROWS_PER_LAYER * N_LAYERS   # 24


# ---------------- in-kernel helpers (plain jnp, traced inside the kernel) ----------------
def _layernorm(x, g, b, eps):
    mean = jnp.mean(x, axis=-1, keepdims=True)
    xc = x - mean
    var = jnp.mean(xc * xc, axis=-1, keepdims=True)
    return xc * lax.rsqrt(var + eps) * g + b


def _gelu_tanh(x):
    # TODO(synk): HF BERT's default act is exact erf-GELU; tanh approx kept (EUP-friendly lowering).
    return 0.5 * x * (1.0 + jnp.tanh(0.7978845608028654 * (x + 0.044715 * x * x * x)))


# ---------------- single fused forward kernel ----------------
def _fused_forward_kernel(ids_ref, mask_ref, emb_tab_ref,
                          wqkv_ref, wo_ref, wi_ref, wo2_ref, vec_ref,
                          out_ref, *, batch, seq):
    f32 = jnp.float32
    bf16 = jnp.bfloat16
    bs = batch * seq
    tab_rows = VOCAB + MAX_POS

    def vrow(r, width):                      # (1, width) f32 slice of the packed vector slab
        return vec_ref[r:r + 1, 0:width]

    # --- embeddings: word + position (+token-type-0 folded into the pos rows) as ONE two-hot matmul ---
    ids = ids_ref[...]                                                        # (bs, 1) int32
    col = lax.broadcasted_iota(jnp.int32, (bs, tab_rows), 1)
    pos_blk = lax.broadcasted_iota(jnp.int32, (seq, tab_rows), 0) + VOCAB     # row s -> VOCAB + s
    pos_idx = jnp.concatenate([pos_blk] * batch, axis=0)                      # (bs, tab_rows)
    two_hot = jnp.logical_or(col == ids, col == pos_idx)
    sel = jnp.where(two_hot, 1.0, 0.0).astype(bf16)                           # (bs, tab_rows)
    x = jnp.dot(sel, emb_tab_ref[...], preferred_element_type=f32)            # (bs, HIDDEN)
    x = _layernorm(x, vrow(ROW_EMB_LN_G, HIDDEN), vrow(ROW_EMB_LN_B, HIDDEN), LN_EPS_BACKBONE)

    # --- additive score mask (key padding + batch-block-diagonal), built ONCE before the layer loop ---
    key_bias = (1.0 - mask_ref[...]) * NEG_BIG                                # (1, bs)
    ri = lax.broadcasted_iota(jnp.int32, (bs, bs), 0)
    ci = lax.broadcasted_iota(jnp.int32, (bs, bs), 1)
    same_batch = None
    for b in range(batch):
        rin = jnp.logical_and(ri >= b * seq, ri < (b + 1) * seq)
        cin = jnp.logical_and(ci >= b * seq, ci < (b + 1) * seq)
        term = jnp.logical_and(rin, cin)
        same_batch = term if same_batch is None else jnp.logical_or(same_batch, term)
    attn_bias = jnp.where(same_batch, 0.0, NEG_BIG) + key_bias                # (bs, bs) f32

    # --- encoder layers, statically unrolled in-kernel ---
    for layer in range(N_LAYERS):
        base = ROW_LAYER_BASE + layer * ROWS_PER_LAYER
        # Fused QKV projection: one (bs, 32) x (32, 96) bf16 MXU pass (attn scale pre-folded into Q).
        qkv = jnp.dot(x.astype(bf16), wqkv_ref[layer],
                      preferred_element_type=f32) + vrow(base + LROW_BQKV, 3 * HIDDEN)
        wo_l = wo_ref[layer]                                                  # (HIDDEN, HIDDEN) bf16

        # Per-head attention batched over the batch dim via the block-diagonal mask:
        # one (bs,bs) score matmul + one PV matmul per head; the head concat is folded into
        # split output-projection matmuls (no concatenates, no batch loop).
        attn_out = vrow(base + LROW_BO, HIDDEN)                               # (1, HIDDEN) bias
        for h in range(N_HEADS):
            c = h * HEAD_DIM
            q = qkv[:, c:c + HEAD_DIM].astype(bf16)                           # (bs, D)
            k = qkv[:, HIDDEN + c:HIDDEN + c + HEAD_DIM].astype(bf16)
            v = qkv[:, 2 * HIDDEN + c:2 * HIDDEN + c + HEAD_DIM].astype(bf16)
            s = lax.dot_general(q, k, (((1,), (1,)), ((), ())),
                                preferred_element_type=f32) + attn_bias       # (bs, bs)
            m = jnp.max(s, axis=-1, keepdims=True)
            p = jnp.exp(s - m)
            p = p / jnp.sum(p, axis=-1, keepdims=True)                        # exact softmax
            ctx = jnp.dot(p.astype(bf16), v, preferred_element_type=f32)      # (bs, D)
            attn_out = attn_out + jnp.dot(ctx.astype(bf16), wo_l[c:c + HEAD_DIM, :],
                                          preferred_element_type=f32)
        x = _layernorm(attn_out + x, vrow(base + LROW_LN1G, HIDDEN),
                       vrow(base + LROW_LN1B, HIDDEN), LN_EPS_BACKBONE)

        ff = jnp.dot(x.astype(bf16), wi_ref[layer],
                     preferred_element_type=f32) + vrow(base + LROW_BI, INTERMEDIATE)
        ff = _gelu_tanh(ff)
        ff = jnp.dot(ff.astype(bf16), wo2_ref[layer],
                     preferred_element_type=f32) + vrow(base + LROW_BO2, HIDDEN)
        x = _layernorm(ff + x, vrow(base + LROW_LN2G, HIDDEN),
                       vrow(base + LROW_LN2B, HIDDEN), LN_EPS_BACKBONE)

    # --- CLS rows + classification head; everything stored into ONE lane-dense (8,128) slab ---
    cls_rows = jnp.concatenate([x[b * seq:b * seq + 1, :] for b in range(batch)], axis=0)  # (B, HIDDEN)
    hcls = _layernorm(cls_rows, vrow(ROW_CLS_LN_G, HIDDEN), vrow(ROW_CLS_LN_B, HIDDEN), LN_EPS_HEAD)
    cls_wt = vec_ref[ROW_CLS_WT:ROW_CLS_WT + N_OUTPUT, 0:HIDDEN]              # (N_OUTPUT, HIDDEN)
    logits = lax.dot_general(hcls.astype(bf16), cls_wt.astype(bf16),
                             (((1,), (1,)), ((), ())),
                             preferred_element_type=f32) + vrow(ROW_CLS_B, N_OUTPUT)

    out_ref[...] = jnp.zeros(out_ref.shape, f32)
    out_ref[0:batch, 0:N_OUTPUT] = logits
    out_ref[0:batch, HIDDEN:2 * HIDDEN] = cls_rows


def fused_forward(ids_col, mask_row, p, batch, seq):
    kern = functools.partial(_fused_forward_kernel, batch=batch, seq=seq)
    vmem = pl.BlockSpec(memory_space=pltpu.MemorySpace.VMEM)
    inputs = (ids_col, mask_row, p["emb_tab"], p["wqkv"], p["wo"], p["wi"], p["wo2"], p["vec"])
    out_rows = max(8, batch)
    # TODO(synk): at toy batch the grid-less kernel runs on one TC; if B grows, add a leading
    # "parallel" grid axis over batch so the v7x second TensorCore gets work.
    return pl.pallas_call(
        kern,
        out_shape=jax.ShapeDtypeStruct((out_rows, VEC_WIDTH), jnp.float32),
        in_specs=[vmem] * len(inputs),
        out_specs=vmem,
    )(*inputs)


# ---------------- deterministic parameter init (pre-packed for the fused kernel) ----------------
def init_params(key):
    scale = 0.02
    keys = iter(jax.random.split(key, 64))
    bf16 = jnp.bfloat16

    def nrm(shape):
        return scale * jax.random.normal(next(keys), shape, dtype=jnp.float32)

    def pad_row(v):
        v = jnp.asarray(v, jnp.float32).reshape(-1)
        return jnp.pad(v, (0, VEC_WIDTH - v.shape[0]))

    attn_scale = 1.0 / (HEAD_DIM ** 0.5)    # folded into Q weight (and Q bias) at pack time

    word_emb = nrm((VOCAB, HIDDEN))
    pos_emb = nrm((MAX_POS, HIDDEN))
    type_emb = nrm((2, HIDDEN))
    # forward always uses token-type 0 -> fold type_emb[0] into the position rows of the table
    emb_tab = jnp.concatenate([word_emb, pos_emb + type_emb[0][None, :]], axis=0).astype(bf16)

    vec_rows = [None] * N_VEC_ROWS
    vec_rows[ROW_EMB_LN_G] = jnp.ones((HIDDEN,), jnp.float32)
    vec_rows[ROW_EMB_LN_B] = jnp.zeros((HIDDEN,), jnp.float32)
    vec_rows[ROW_CLS_LN_G] = jnp.ones((HIDDEN,), jnp.float32)
    vec_rows[ROW_CLS_LN_B] = jnp.zeros((HIDDEN,), jnp.float32)
    vec_rows[ROW_CLS_B] = jnp.zeros((N_OUTPUT,), jnp.float32)
    cls_w = nrm((HIDDEN, N_OUTPUT))
    for i in range(N_OUTPUT):
        vec_rows[ROW_CLS_WT + i] = cls_w[:, i]                 # cls_w^T rows

    wqkv, wo, wi, wo2 = [], [], [], []
    for l in range(N_LAYERS):
        base = ROW_LAYER_BASE + l * ROWS_PER_LAYER
        wq = nrm((HIDDEN, HIDDEN)) * attn_scale
        wk = nrm((HIDDEN, HIDDEN))
        wv = nrm((HIDDEN, HIDDEN))
        wqkv.append(jnp.concatenate([wq, wk, wv], axis=1))     # (HIDDEN, 3*HIDDEN)
        bq = jnp.zeros((HIDDEN,), jnp.float32) * attn_scale    # Q bias carries the folded scale too
        bk = jnp.zeros((HIDDEN,), jnp.float32)
        bv = jnp.zeros((HIDDEN,), jnp.float32)
        vec_rows[base + LROW_BQKV] = jnp.concatenate([bq, bk, bv])
        wo.append(nrm((HIDDEN, HIDDEN)))
        vec_rows[base + LROW_BO] = jnp.zeros((HIDDEN,), jnp.float32)
        vec_rows[base + LROW_LN1G] = jnp.ones((HIDDEN,), jnp.float32)
        vec_rows[base + LROW_LN1B] = jnp.zeros((HIDDEN,), jnp.float32)
        wi.append(nrm((HIDDEN, INTERMEDIATE)))
        vec_rows[base + LROW_BI] = jnp.zeros((INTERMEDIATE,), jnp.float32)
        wo2.append(nrm((INTERMEDIATE, HIDDEN)))
        vec_rows[base + LROW_BO2] = jnp.zeros((HIDDEN,), jnp.float32)
        vec_rows[base + LROW_LN2G] = jnp.ones((HIDDEN,), jnp.float32)
        vec_rows[base + LROW_LN2B] = jnp.zeros((HIDDEN,), jnp.float32)

    return {
        "emb_tab": emb_tab,                                    # (VOCAB+MAX_POS, HIDDEN) bf16
        "wqkv": jnp.stack(wqkv).astype(bf16),                  # (L, HIDDEN, 3*HIDDEN)  bf16
        "wo": jnp.stack(wo).astype(bf16),                      # (L, HIDDEN, HIDDEN)    bf16
        "wi": jnp.stack(wi).astype(bf16),                      # (L, HIDDEN, INTER)     bf16
        "wo2": jnp.stack(wo2).astype(bf16),                    # (L, INTER, HIDDEN)     bf16
        "vec": jnp.stack([pad_row(r) for r in vec_rows]),      # (N_VEC_ROWS, 128)      f32
    }


# ---------------- forward pass (matches BaseArchitecture.forward, eval mode) ----------------
def forward(params, ids, mask):
    B, S = ids.shape
    ids_col = ids.reshape(B * S, 1).astype(jnp.int32)          # word ids, one per row
    mask_row = mask.reshape(1, B * S).astype(jnp.float32)      # key mask along lanes
    out = fused_forward(ids_col, mask_row, params, B, S)       # (8, 128) packed slab
    cls_out = out[:B, :N_OUTPUT]                               # classification_output
    emb_out = out[:B, HIDDEN:2 * HIDDEN]                       # embedding_output (CLS hidden state)
    return cls_out, emb_out


if __name__ == "__main__":
    key = jax.random.PRNGKey(0)
    pkey, ikey = jax.random.split(key)
    params = init_params(pkey)

    B, S = 2, 8
    ids = jax.random.randint(ikey, (B, S), 0, VOCAB, dtype=jnp.int32)
    mask = jnp.ones((B, S), dtype=jnp.int32).at[1, 6:].set(0)  # pad tail of 2nd example

    cls_out, emb_out = jax.jit(forward)(params, ids, mask)
    jax.block_until_ready((cls_out, emb_out))
    assert cls_out.shape == (B, N_OUTPUT) and cls_out.dtype == jnp.float32
    assert emb_out.shape == (B, HIDDEN) and emb_out.dtype == jnp.float32
    assert bool(jnp.all(jnp.isfinite(cls_out))) and bool(jnp.all(jnp.isfinite(emb_out)))
    print("KERNEL_OK")
</pallas_src>

<mosaic_0001>
module attributes {stable_mosaic.version = 11 : i64} {
  func.func @_fused_forward_kernel(%arg0: memref<16x1xi32, #tpu.memory_space<vmem>>, %arg1: memref<1x16xf32, #tpu.memory_space<vmem>>, %arg2: memref<116x32xbf16, #tpu.memory_space<vmem>>, %arg3: memref<2x32x96xbf16, #tpu.memory_space<vmem>>, %arg4: memref<2x32x32xbf16, #tpu.memory_space<vmem>>, %arg5: memref<2x32x64xbf16, #tpu.memory_space<vmem>>, %arg6: memref<2x64x32xbf16, #tpu.memory_space<vmem>>, %arg7: memref<24x128xf32, #tpu.memory_space<vmem>>, %arg8: memref<8x128xf32, #tpu.memory_space<vmem>>) attributes {dimension_semantics = [], scalar_prefetch = 0 : i64, scratch_operands = 0 : i64, tpu.core_type = #tpu.core_type<tc>} {
    %c0 = arith.constant 0 : index
    %c0_0 = arith.constant 0 : index
    %0 = vector.load %arg0[%c0, %c0_0] : memref<16x1xi32, #tpu.memory_space<vmem>>, vector<16x1xi32>
    %1 = tpu.iota {dimensions = array<i32: 1>} : vector<16x116xi32>
    %2 = tpu.iota {dimensions = array<i32: 0>} : vector<8x116xi32>
    %c100_i32 = arith.constant 100 : i32
    %3 = vector.broadcast %c100_i32 : i32 to vector<8x116xi32>
    %4 = arith.addi %2, %3 : vector<8x116xi32>
    %5 = tpu.concatenate %4, %4 in 0 : vector<8x116xi32>, vector<8x116xi32> -> vector<16x116xi32>
    %6 = vector.broadcast %0 : vector<16x1xi32> to vector<16x116xi32>
    %7 = arith.cmpi eq, %1, %6 : vector<16x116xi32>
    %8 = arith.cmpi eq, %1, %5 : vector<16x116xi32>
    %9 = arith.ori %7, %8 : vector<16x116xi1>
    %cst = arith.constant 1.000000e+00 : f32
    %cst_1 = arith.constant 0.000000e+00 : f32
    %10 = vector.broadcast %cst : f32 to vector<16x116xf32>
    %11 = vector.broadcast %cst_1 : f32 to vector<16x116xf32>
    %12 = arith.select %9, %10, %11 : vector<16x116xi1>, vector<16x116xf32>
    %13 = arith.truncf %12 : vector<16x116xf32> to vector<16x116xbf16>
    %c0_2 = arith.constant 0 : index
    %c0_3 = arith.constant 0 : index
    %14 = vector.load %arg2[%c0_2, %c0_3] : memref<116x32xbf16, #tpu.memory_space<vmem>>, vector<116x32xbf16>
    %cst_4 = arith.constant dense<0.000000e+00> : vector<16x32xf32>
    %15 = tpu.matmul %13, %14, %cst_4 {dimension_numbers = #tpu.dot_dimension_numbers<[1], [0], [0], [1], [0, 0, 1, 1], [], []>} : vector<16x116xbf16>, vector<116x32xbf16>, vector<16x32xf32> -> vector<16x32xf32>
    %c0_5 = arith.constant 0 : index
    %c0_6 = arith.constant 0 : index
    %16 = vector.load %arg7[%c0_5, %c0_6] : memref<24x128xf32, #tpu.memory_space<vmem>>, vector<1x32xf32>
    %c1 = arith.constant 1 : index
    %c0_7 = arith.constant 0 : index
    %17 = vector.load %arg7[%c1, %c0_7] : memref<24x128xf32, #tpu.memory_space<vmem>>, vector<1x32xf32>
    %cst_8 = arith.constant dense<0.000000e+00> : vector<16xf32>
    %18 = vector.multi_reduction <add>, %15, %cst_8 [1] : vector<16x32xf32> to vector<16xf32>
    %19 = vector.shape_cast %18 : vector<16xf32> to vector<16x1xf32>
    %cst_9 = arith.constant 3.200000e+01 : f32
    %20 = vector.broadcast %cst_9 : f32 to vector<16x1xf32>
    %21 = arith.divf %19, %20 : vector<16x1xf32>
    %22 = vector.broadcast %21 : vector<16x1xf32> to vector<16x32xf32>
    %23 = arith.subf %15, %22 : vector<16x32xf32>
    %24 = arith.mulf %23, %23 : vector<16x32xf32>
    %cst_10 = arith.constant dense<0.000000e+00> : vector<16xf32>
    %25 = vector.multi_reduction <add>, %24, %cst_10 [1] : vector<16x32xf32> to vector<16xf32>
    %26 = vector.shape_cast %25 : vector<16xf32> to vector<16x1xf32>
    %cst_11 = arith.constant 3.200000e+01 : f32
    %27 = vector.broadcast %cst_11 : f32 to vector<16x1xf32>
    %28 = arith.divf %26, %27 : vector<16x1xf32>
    %cst_12 = arith.constant 9.99999996E-13 : f32
    %29 = vector.broadcast %cst_12 : f32 to vector<16x1xf32>
    %30 = arith.addf %28, %29 : vector<16x1xf32>
    %31 = math.rsqrt %30 : vector<16x1xf32>
    %32 = vector.broadcast %31 : vector<16x1xf32> to vector<16x32xf32>
    %33 = arith.mulf %23, %32 : vector<16x32xf32>
    %34 = vector.broadcast %16 : vector<1x32xf32> to vector<16x32xf32>
    %35 = arith.mulf %33, %34 : vector<16x32xf32>
    %36 = vector.broadcast %17 : vector<1x32xf32> to vector<16x32xf32>
    %37 = arith.addf %35, %36 : vector<16x32xf32>
    %c0_13 = arith.constant 0 : index
    %c0_14 = arith.constant 0 : index
    %38 = vector.load %arg1[%c0_13, %c0_14] : memref<1x16xf32, #tpu.memory_space<vmem>>, vector<1x16xf32>
    %cst_15 = arith.constant 1.000000e+00 : f32
    %39 = vector.broadcast %cst_15 : f32 to vector<1x16xf32>
    %40 = arith.subf %39, %38 : vector<1x16xf32>
    %cst_16 = arith.constant -1.000000e+09 : f32
    %41 = vector.broadcast %cst_16 : f32 to vector<1x16xf32>
    %42 = arith.mulf %40, %41 : vector<1x16xf32>
    %43 = tpu.iota {dimensions = array<i32: 0>} : vector<16x16xi32>
    %44 = tpu.iota {dimensions = array<i32: 1>} : vector<16x16xi32>
    %c0_i32 = arith.constant 0 : i32
    %45 = vector.broadcast %c0_i32 : i32 to vector<16x16xi32>
    %46 = arith.cmpi sge, %43, %45 : vector<16x16xi32>
    %c8_i32 = arith.constant 8 : i32
    %47 = vector.broadcast %c8_i32 : i32 to vector<16x16xi32>
    %48 = arith.cmpi slt, %43, %47 : vector<16x16xi32>
    %49 = arith.andi %46, %48 : vector<16x16xi1>
    %c0_i32_17 = arith.constant 0 : i32
    %50 = vector.broadcast %c0_i32_17 : i32 to vector<16x16xi32>
    %51 = arith.cmpi sge, %44, %50 : vector<16x16xi32>
    %c8_i32_18 = arith.constant 8 : i32
    %52 = vector.broadcast %c8_i32_18 : i32 to vector<16x16xi32>
    %53 = arith.cmpi slt, %44, %52 : vector<16x16xi32>
    %54 = arith.andi %51, %53 : vector<16x16xi1>
    %55 = arith.andi %49, %54 : vector<16x16xi1>
    %c8_i32_19 = arith.constant 8 : i32
    %56 = vector.broadcast %c8_i32_19 : i32 to vector<16x16xi32>
    %57 = arith.cmpi sge, %43, %56 : vector<16x16xi32>
    %c16_i32 = arith.constant 16 : i32
    %58 = vector.broadcast %c16_i32 : i32 to vector<16x16xi32>
    %59 = arith.cmpi slt, %43, %58 : vector<16x16xi32>
    %60 = arith.andi %57, %59 : vector<16x16xi1>
    %c8_i32_20 = arith.constant 8 : i32
    %61 = vector.broadcast %c8_i32_20 : i32 to vector<16x16xi32>
    %62 = arith.cmpi sge, %44, %61 : vector<16x16xi32>
    %c16_i32_21 = arith.constant 16 : i32
    %63 = vector.broadcast %c16_i32_21 : i32 to vector<16x16xi32>
    %64 = arith.cmpi slt, %44, %63 : vector<16x16xi32>
    %65 = arith.andi %62, %64 : vector<16x16xi1>
    %66 = arith.andi %60, %65 : vector<16x16xi1>
    %67 = arith.ori %55, %66 : vector<16x16xi1>
    %cst_22 = arith.constant 0.000000e+00 : f32
    %cst_23 = arith.constant -1.000000e+09 : f32
    %68 = vector.broadcast %cst_22 : f32 to vector<16x16xf32>
    %69 = vector.broadcast %cst_23 : f32 to vector<16x16xf32>
    %70 = arith.select %67, %68, %69 : vector<16x16xi1>, vector<16x16xf32>
    %71 = vector.broadcast %42 : vector<1x16xf32> to vector<16x16xf32>
    %72 = arith.addf %70, %71 : vector<16x16xf32>
    %73 = arith.truncf %37 : vector<16x32xf32> to vector<16x32xbf16>
    %c0_24 = arith.constant 0 : index
    %c0_25 = arith.constant 0 : index
    %c0_26 = arith.constant 0 : index
    %74 = vector.load %arg3[%c0_24, %c0_25, %c0_26] : memref<2x32x96xbf16, #tpu.memory_space<vmem>>, vector<1x32x96xbf16>
    %75 = vector.shape_cast %74 : vector<1x32x96xbf16> to vector<32x96xbf16>
    %cst_27 = arith.constant dense<0.000000e+00> : vector<16x96xf32>
    %76 = tpu.matmul %73, %75, %cst_27 {dimension_numbers = #tpu.dot_dimension_numbers<[1], [0], [0], [1], [0, 0, 1, 1], [], []>} : vector<16x32xbf16>, vector<32x96xbf16>, vector<16x96xf32> -> vector<16x96xf32>
    %c8 = arith.constant 8 : index
    %c0_28 = arith.constant 0 : index
    %77 = vector.load %arg7[%c8, %c0_28] : memref<24x128xf32, #tpu.memory_space<vmem>>, vector<1x96xf32>
    %78 = vector.broadcast %77 : vector<1x96xf32> to vector<16x96xf32>
    %79 = arith.addf %76, %78 : vector<16x96xf32>
    %c0_29 = arith.constant 0 : index
    %c0_30 = arith.constant 0 : index
    %c0_31 = arith.constant 0 : index
    %80 = vector.load %arg4[%c0_29, %c0_30, %c0_31] : memref<2x32x32xbf16, #tpu.memory_space<vmem>>, vector<1x32x32xbf16>
    %81 = vector.shape_cast %80 : vector<1x32x32xbf16> to vector<32x32xbf16>
    %c9 = arith.constant 9 : index
    %c0_32 = arith.constant 0 : index
    %82 = vector.load %arg7[%c9, %c0_32] : memref<24x128xf32, #tpu.memory_space<vmem>>, vector<1x32xf32>
    %83 = vector.extract_strided_slice %79 {offsets = [0, 0], sizes = [16, 16], strides = [1, 1]} : vector<16x96xf32> to vector<16x16xf32>
    %84 = arith.truncf %83 : vector<16x16xf32> to vector<16x16xbf16>
    %85 = vector.extract_strided_slice %79 {offsets = [0, 32], sizes = [16, 16], strides = [1, 1]} : vector<16x96xf32> to vector<16x16xf32>
    %86 = arith.truncf %85 : vector<16x16xf32> to vector<16x16xbf16>
    %87 = vector.extract_strided_slice %79 {offsets = [0, 64], sizes = [16, 16], strides = [1, 1]} : vector<16x96xf32> to vector<16x16xf32>
    %88 = arith.truncf %87 : vector<16x16xf32> to vector<16x16xbf16>
    %cst_33 = arith.constant dense<0.000000e+00> : vector<16x16xf32>
    %89 = tpu.matmul %84, %86, %cst_33 {dimension_numbers = #tpu.dot_dimension_numbers<[1], [1], [0], [0], [0, 0, 1, 0], [], []>} : vector<16x16xbf16>, vector<16x16xbf16>, vector<16x16xf32> -> vector<16x16xf32>
    %90 = arith.addf %89, %72 : vector<16x16xf32>
    %cst_34 = arith.constant dense<0xFF800000> : vector<16xf32>
    %91 = vector.multi_reduction <maximumf>, %90, %cst_34 [1] : vector<16x16xf32> to vector<16xf32>
    %92 = vector.shape_cast %91 : vector<16xf32> to vector<16x1xf32>
    %93 = vector.broadcast %92 : vector<16x1xf32> to vector<16x16xf32>
    %94 = arith.subf %90, %93 : vector<16x16xf32>
    %95 = math.exp %94 : vector<16x16xf32>
    %cst_35 = arith.constant dense<0.000000e+00> : vector<16xf32>
    %96 = vector.multi_reduction <add>, %95, %cst_35 [1] : vector<16x16xf32> to vector<16xf32>
    %97 = vector.shape_cast %96 : vector<16xf32> to vector<16x1xf32>
    %98 = vector.broadcast %97 : vector<16x1xf32> to vector<16x16xf32>
    %99 = arith.divf %95, %98 : vector<16x16xf32>
    %100 = arith.truncf %99 : vector<16x16xf32> to vector<16x16xbf16>
    %cst_36 = arith.constant dense<0.000000e+00> : vector<16x16xf32>
    %101 = tpu.matmul %100, %88, %cst_36 {dimension_numbers = #tpu.dot_dimension_numbers<[1], [0], [0], [1], [0, 0, 1, 1], [], []>} : vector<16x16xbf16>, vector<16x16xbf16>, vector<16x16xf32> -> vector<16x16xf32>
    %102 = arith.truncf %101 : vector<16x16xf32> to vector<16x16xbf16>
    %103 = vector.extract_strided_slice %81 {offsets = [0, 0], sizes = [16, 32], strides = [1, 1]} : vector<32x32xbf16> to vector<16x32xbf16>
    %cst_37 = arith.constant dense<0.000000e+00> : vector<16x32xf32>
    %104 = tpu.matmul %102, %103, %cst_37 {dimension_numbers = #tpu.dot_dimension_numbers<[1], [0], [0], [1], [0, 0, 1, 1], [], []>} : vector<16x16xbf16>, vector<16x32xbf16>, vector<16x32xf32> -> vector<16x32xf32>
    %105 = vector.broadcast %82 : vector<1x32xf32> to vector<16x32xf32>
    %106 = arith.addf %105, %104 : vector<16x32xf32>
    %107 = vector.extract_strided_slice %79 {offsets = [0, 16], sizes = [16, 16], strides = [1, 1]} : vector<16x96xf32> to vector<16x16xf32>
    %108 = arith.truncf %107 : vector<16x16xf32> to vector<16x16xbf16>
    %109 = vector.extract_strided_slice %79 {offsets = [0, 48], sizes = [16, 16], strides = [1, 1]} : vector<16x96xf32> to vector<16x16xf32>
    %110 = arith.truncf %109 : vector<16x16xf32> to vector<16x16xbf16>
    %111 = vector.extract_strided_slice %79 {offsets = [0, 80], sizes = [16, 16], strides = [1, 1]} : vector<16x96xf32> to vector<16x16xf32>
    %112 = arith.truncf %111 : vector<16x16xf32> to vector<16x16xbf16>
    %cst_38 = arith.constant dense<0.000000e+00> : vector<16x16xf32>
    %113 = tpu.matmul %108, %110, %cst_38 {dimension_numbers = #tpu.dot_dimension_numbers<[1], [1], [0], [0], [0, 0, 1, 0], [], []>} : vector<16x16xbf16>, vector<16x16xbf16>, vector<16x16xf32> -> vector<16x16xf32>
    %114 = arith.addf %113, %72 : vector<16x16xf32>
    %cst_39 = arith.constant dense<0xFF800000> : vector<16xf32>
    %115 = vector.multi_reduction <maximumf>, %114, %cst_39 [1] : vector<16x16xf32> to vector<16xf32>
    %116 = vector.shape_cast %115 : vector<16xf32> to vector<16x1xf32>
    %117 = vector.broadcast %116 : vector<16x1xf32> to vector<16x16xf32>
    %118 = arith.subf %114, %117 : vector<16x16xf32>
    %119 = math.exp %118 : vector<16x16xf32>
    %cst_40 = arith.constant dense<0.000000e+00> : vector<16xf32>
    %120 = vector.multi_reduction <add>, %119, %cst_40 [1] : vector<16x16xf32> to vector<16xf32>
    %121 = vector.shape_cast %120 : vector<16xf32> to vector<16x1xf32>
    %122 = vector.broadcast %121 : vector<16x1xf32> to vector<16x16xf32>
    %123 = arith.divf %119, %122 : vector<16x16xf32>
    %124 = arith.truncf %123 : vector<16x16xf32> to vector<16x16xbf16>
    %cst_41 = arith.constant dense<0.000000e+00> : vector<16x16xf32>
    %125 = tpu.matmul %124, %112, %cst_41 {dimension_numbers = #tpu.dot_dimension_numbers<[1], [0], [0], [1], [0, 0, 1, 1], [], []>} : vector<16x16xbf16>, vector<16x16xbf16>, vector<16x16xf32> -> vector<16x16xf32>
    %126 = arith.truncf %125 : vector<16x16xf32> to vector<16x16xbf16>
    %127 = vector.extract_strided_slice %81 {offsets = [16, 0], sizes = [16, 32], strides = [1, 1]} : vector<32x32xbf16> to vector<16x32xbf16>
    %cst_42 = arith.constant dense<0.000000e+00> : vector<16x32xf32>
    %128 = tpu.matmul %126, %127, %cst_42 {dimension_numbers = #tpu.dot_dimension_numbers<[1], [0], [0], [1], [0, 0, 1, 1], [], []>} : vector<16x16xbf16>, vector<16x32xbf16>, vector<16x32xf32> -> vector<16x32xf32>
    %129 = arith.addf %106, %128 : vector<16x32xf32>
    %130 = arith.addf %129, %37 : vector<16x32xf32>
    %c10 = arith.constant 10 : index
    %c0_43 = arith.constant 0 : index
    %131 = vector.load %arg7[%c10, %c0_43] : memref<24x128xf32, #tpu.memory_space<vmem>>, vector<1x32xf32>
    %c11 = arith.constant 11 : index
    %c0_44 = arith.constant 0 : index
    %132 = vector.load %arg7[%c11, %c0_44] : memref<24x128xf32, #tpu.memory_space<vmem>>, vector<1x32xf32>
    %cst_45 = arith.constant dense<0.000000e+00> : vector<16xf32>
    %133 = vector.multi_reduction <add>, %130, %cst_45 [1] : vector<16x32xf32> to vector<16xf32>
    %134 = vector.shape_cast %133 : vector<16xf32> to vector<16x1xf32>
    %cst_46 = arith.constant 3.200000e+01 : f32
    %135 = vector.broadcast %cst_46 : f32 to vector<16x1xf32>
    %136 = arith.divf %134, %135 : vector<16x1xf32>
    %137 = vector.broadcast %136 : vector<16x1xf32> to vector<16x32xf32>
    %138 = arith.subf %130, %137 : vector<16x32xf32>
    %139 = arith.mulf %138, %138 : vector<16x32xf32>
    %cst_47 = arith.constant dense<0.000000e+00> : vector<16xf32>
    %140 = vector.multi_reduction <add>, %139, %cst_47 [1] : vector<16x32xf32> to vector<16xf32>
    %141 = vector.shape_cast %140 : vector<16xf32> to vector<16x1xf32>
    %cst_48 = arith.constant 3.200000e+01 : f32
    %142 = vector.broadcast %cst_48 : f32 to vector<16x1xf32>
    %143 = arith.divf %141, %142 : vector<16x1xf32>
    %cst_49 = arith.constant 9.99999996E-13 : f32
    %144 = vector.broadcast %cst_49 : f32 to vector<16x1xf32>
    %145 = arith.addf %143, %144 : vector<16x1xf32>
    %146 = math.rsqrt %145 : vector<16x1xf32>
    %147 = vector.broadcast %146 : vector<16x1xf32> to vector<16x32xf32>
    %148 = arith.mulf %138, %147 : vector<16x32xf32>
    %149 = vector.broadcast %131 : vector<1x32xf32> to vector<16x32xf32>
    %150 = arith.mulf %148, %149 : vector<16x32xf32>
    %151 = vector.broadcast %132 : vector<1x32xf32> to vector<16x32xf32>
    %152 = arith.addf %150, %151 : vector<16x32xf32>
    %153 = arith.truncf %152 : vector<16x32xf32> to vector<16x32xbf16>
    %c0_50 = arith.constant 0 : index
    %c0_51 = arith.constant 0 : index
    %c0_52 = arith.constant 0 : index
    %154 = vector.load %arg5[%c0_50, %c0_51, %c0_52] : memref<2x32x64xbf16, #tpu.memory_space<vmem>>, vector<1x32x64xbf16>
    %155 = vector.shape_cast %154 : vector<1x32x64xbf16> to vector<32x64xbf16>
    %cst_53 = arith.constant dense<0.000000e+00> : vector<16x64xf32>
    %156 = tpu.matmul %153, %155, %cst_53 {dimension_numbers = #tpu.dot_dimension_numbers<[1], [0], [0], [1], [0, 0, 1, 1], [], []>} : vector<16x32xbf16>, vector<32x64xbf16>, vector<16x64xf32> -> vector<16x64xf32>
    %c12 = arith.constant 12 : index
    %c0_54 = arith.constant 0 : index
    %157 = vector.load %arg7[%c12, %c0_54] : memref<24x128xf32, #tpu.memory_space<vmem>>, vector<1x64xf32>
    %158 = vector.broadcast %157 : vector<1x64xf32> to vector<16x64xf32>
    %159 = arith.addf %156, %158 : vector<16x64xf32>
    %cst_55 = arith.constant 5.000000e-01 : f32
    %160 = vector.broadcast %cst_55 : f32 to vector<16x64xf32>
    %161 = arith.mulf %160, %159 : vector<16x64xf32>
    %cst_56 = arith.constant 4.471500e-02 : f32
    %162 = vector.broadcast %cst_56 : f32 to vector<16x64xf32>
    %163 = arith.mulf %162, %159 : vector<16x64xf32>
    %164 = arith.mulf %163, %159 : vector<16x64xf32>
    %165 = arith.mulf %164, %159 : vector<16x64xf32>
    %166 = arith.addf %159, %165 : vector<16x64xf32>
    %cst_57 = arith.constant 0.797884583 : f32
    %167 = vector.broadcast %cst_57 : f32 to vector<16x64xf32>
    %168 = arith.mulf %167, %166 : vector<16x64xf32>
    %169 = math.tanh %168 : vector<16x64xf32>
    %cst_58 = arith.constant 1.000000e+00 : f32
    %170 = vector.broadcast %cst_58 : f32 to vector<16x64xf32>
    %171 = arith.addf %170, %169 : vector<16x64xf32>
    %172 = arith.mulf %161, %171 : vector<16x64xf32>
    %173 = arith.truncf %172 : vector<16x64xf32> to vector<16x64xbf16>
    %c0_59 = arith.constant 0 : index
    %c0_60 = arith.constant 0 : index
    %c0_61 = arith.constant 0 : index
    %174 = vector.load %arg6[%c0_59, %c0_60, %c0_61] : memref<2x64x32xbf16, #tpu.memory_space<vmem>>, vector<1x64x32xbf16>
    %175 = vector.shape_cast %174 : vector<1x64x32xbf16> to vector<64x32xbf16>
    %cst_62 = arith.constant dense<0.000000e+00> : vector<16x32xf32>
    %176 = tpu.matmul %173, %175, %cst_62 {dimension_numbers = #tpu.dot_dimension_numbers<[1], [0], [0], [1], [0, 0, 1, 1], [], []>} : vector<16x64xbf16>, vector<64x32xbf16>, vector<16x32xf32> -> vector<16x32xf32>
    %c13 = arith.constant 13 : index
    %c0_63 = arith.constant 0 : index
    %177 = vector.load %arg7[%c13, %c0_63] : memref<24x128xf32, #tpu.memory_space<vmem>>, vector<1x32xf32>
    %178 = vector.broadcast %177 : vector<1x32xf32> to vector<16x32xf32>
    %179 = arith.addf %176, %178 : vector<16x32xf32>
    %180 = arith.addf %179, %152 : vector<16x32xf32>
    %c14 = arith.constant 14 : index
    %c0_64 = arith.constant 0 : index
    %181 = vector.load %arg7[%c14, %c0_64] : memref<24x128xf32, #tpu.memory_space<vmem>>, vector<1x32xf32>
    %c15 = arith.constant 15 : index
    %c0_65 = arith.constant 0 : index
    %182 = vector.load %arg7[%c15, %c0_65] : memref<24x128xf32, #tpu.memory_space<vmem>>, vector<1x32xf32>
    %cst_66 = arith.constant dense<0.000000e+00> : vector<16xf32>
    %183 = vector.multi_reduction <add>, %180, %cst_66 [1] : vector<16x32xf32> to vector<16xf32>
    %184 = vector.shape_cast %183 : vector<16xf32> to vector<16x1xf32>
    %cst_67 = arith.constant 3.200000e+01 : f32
    %185 = vector.broadcast %cst_67 : f32 to vector<16x1xf32>
    %186 = arith.divf %184, %185 : vector<16x1xf32>
    %187 = vector.broadcast %186 : vector<16x1xf32> to vector<16x32xf32>
    %188 = arith.subf %180, %187 : vector<16x32xf32>
    %189 = arith.mulf %188, %188 : vector<16x32xf32>
    %cst_68 = arith.constant dense<0.000000e+00> : vector<16xf32>
    %190 = vector.multi_reduction <add>, %189, %cst_68 [1] : vector<16x32xf32> to vector<16xf32>
    %191 = vector.shape_cast %190 : vector<16xf32> to vector<16x1xf32>
    %cst_69 = arith.constant 3.200000e+01 : f32
    %192 = vector.broadcast %cst_69 : f32 to vector<16x1xf32>
    %193 = arith.divf %191, %192 : vector<16x1xf32>
    %cst_70 = arith.constant 9.99999996E-13 : f32
    %194 = vector.broadcast %cst_70 : f32 to vector<16x1xf32>
    %195 = arith.addf %193, %194 : vector<16x1xf32>
    %196 = math.rsqrt %195 : vector<16x1xf32>
    %197 = vector.broadcast %196 : vector<16x1xf32> to vector<16x32xf32>
    %198 = arith.mulf %188, %197 : vector<16x32xf32>
    %199 = vector.broadcast %181 : vector<1x32xf32> to vector<16x32xf32>
    %200 = arith.mulf %198, %199 : vector<16x32xf32>
    %201 = vector.broadcast %182 : vector<1x32xf32> to vector<16x32xf32>
    %202 = arith.addf %200, %201 : vector<16x32xf32>
    %203 = arith.truncf %202 : vector<16x32xf32> to vector<16x32xbf16>
    %c1_71 = arith.constant 1 : index
    %c0_72 = arith.constant 0 : index
    %c0_73 = arith.constant 0 : index
    %204 = vector.load %arg3[%c1_71, %c0_72, %c0_73] : memref<2x32x96xbf16, #tpu.memory_space<vmem>>, vector<1x32x96xbf16>
    %205 = vector.shape_cast %204 : vector<1x32x96xbf16> to vector<32x96xbf16>
    %cst_74 = arith.constant dense<0.000000e+00> : vector<16x96xf32>
    %206 = tpu.matmul %203, %205, %cst_74 {dimension_numbers = #tpu.dot_dimension_numbers<[1], [0], [0], [1], [0, 0, 1, 1], [], []>} : vector<16x32xbf16>, vector<32x96xbf16>, vector<16x96xf32> -> vector<16x96xf32>
    %c16 = arith.constant 16 : index
    %c0_75 = arith.constant 0 : index
    %207 = vector.load %arg7[%c16, %c0_75] : memref<24x128xf32, #tpu.memory_space<vmem>>, vector<1x96xf32>
    %208 = vector.broadcast %207 : vector<1x96xf32> to vector<16x96xf32>
    %209 = arith.addf %206, %208 : vector<16x96xf32>
    %c1_76 = arith.constant 1 : index
    %c0_77 = arith.constant 0 : index
    %c0_78 = arith.constant 0 : index
    %210 = vector.load %arg4[%c1_76, %c0_77, %c0_78] : memref<2x32x32xbf16, #tpu.memory_space<vmem>>, vector<1x32x32xbf16>
    %211 = vector.shape_cast %210 : vector<1x32x32xbf16> to vector<32x32xbf16>
    %c17 = arith.constant 17 : index
    %c0_79 = arith.constant 0 : index
    %212 = vector.load %arg7[%c17, %c0_79] : memref<24x128xf32, #tpu.memory_space<vmem>>, vector<1x32xf32>
    %213 = vector.extract_strided_slice %209 {offsets = [0, 0], sizes = [16, 16], strides = [1, 1]} : vector<16x96xf32> to vector<16x16xf32>
    %214 = arith.truncf %213 : vector<16x16xf32> to vector<16x16xbf16>
    %215 = vector.extract_strided_slice %209 {offsets = [0, 32], sizes = [16, 16], strides = [1, 1]} : vector<16x96xf32> to vector<16x16xf32>
    %216 = arith.truncf %215 : vector<16x16xf32> to vector<16x16xbf16>
    %217 = vector.extract_strided_slice %209 {offsets = [0, 64], sizes = [16, 16], strides = [1, 1]} : vector<16x96xf32> to vector<16x16xf32>
    %218 = arith.truncf %217 : vector<16x16xf32> to vector<16x16xbf16>
    %cst_80 = arith.constant dense<0.000000e+00> : vector<16x16xf32>
    %219 = tpu.matmul %214, %216, %cst_80 {dimension_numbers = #tpu.dot_dimension_numbers<[1], [1], [0], [0], [0, 0, 1, 0], [], []>} : vector<16x16xbf16>, vector<16x16xbf16>, vector<16x16xf32> -> vector<16x16xf32>
    %220 = arith.addf %219, %72 : vector<16x16xf32>
    %cst_81 = arith.constant dense<0xFF800000> : vector<16xf32>
    %221 = vector.multi_reduction <maximumf>, %220, %cst_81 [1] : vector<16x16xf32> to vector<16xf32>
    %222 = vector.shape_cast %221 : vector<16xf32> to vector<16x1xf32>
    %223 = vector.broadcast %222 : vector<16x1xf32> to vector<16x16xf32>
    %224 = arith.subf %220, %223 : vector<16x16xf32>
    %225 = math.exp %224 : vector<16x16xf32>
    %cst_82 = arith.constant dense<0.000000e+00> : vector<16xf32>
    %226 = vector.multi_reduction <add>, %225, %cst_82 [1] : vector<16x16xf32> to vector<16xf32>
    %227 = vector.shape_cast %226 : vector<16xf32> to vector<16x1xf32>
    %228 = vector.broadcast %227 : vector<16x1xf32> to vector<16x16xf32>
    %229 = arith.divf %225, %228 : vector<16x16xf32>
    %230 = arith.truncf %229 : vector<16x16xf32> to vector<16x16xbf16>
    %cst_83 = arith.constant dense<0.000000e+00> : vector<16x16xf32>
    %231 = tpu.matmul %230, %218, %cst_83 {dimension_numbers = #tpu.dot_dimension_numbers<[1], [0], [0], [1], [0, 0, 1, 1], [], []>} : vector<16x16xbf16>, vector<16x16xbf16>, vector<16x16xf32> -> vector<16x16xf32>
    %232 = arith.truncf %231 : vector<16x16xf32> to vector<16x16xbf16>
    %233 = vector.extract_strided_slice %211 {offsets = [0, 0], sizes = [16, 32], strides = [1, 1]} : vector<32x32xbf16> to vector<16x32xbf16>
    %cst_84 = arith.constant dense<0.000000e+00> : vector<16x32xf32>
    %234 = tpu.matmul %232, %233, %cst_84 {dimension_numbers = #tpu.dot_dimension_numbers<[1], [0], [0], [1], [0, 0, 1, 1], [], []>} : vector<16x16xbf16>, vector<16x32xbf16>, vector<16x32xf32> -> vector<16x32xf32>
    %235 = vector.broadcast %212 : vector<1x32xf32> to vector<16x32xf32>
    %236 = arith.addf %235, %234 : vector<16x32xf32>
    %237 = vector.extract_strided_slice %209 {offsets = [0, 16], sizes = [16, 16], strides = [1, 1]} : vector<16x96xf32> to vector<16x16xf32>
    %238 = arith.truncf %237 : vector<16x16xf32> to vector<16x16xbf16>
    %239 = vector.extract_strided_slice %209 {offsets = [0, 48], sizes = [16, 16], strides = [1, 1]} : vector<16x96xf32> to vector<16x16xf32>
    %240 = arith.truncf %239 : vector<16x16xf32> to vector<16x16xbf16>
    %241 = vector.extract_strided_slice %209 {offsets = [0, 80], sizes = [16, 16], strides = [1, 1]} : vector<16x96xf32> to vector<16x16xf32>
    %242 = arith.truncf %241 : vector<16x16xf32> to vector<16x16xbf16>
    %cst_85 = arith.constant dense<0.000000e+00> : vector<16x16xf32>
    %243 = tpu.matmul %238, %240, %cst_85 {dimension_numbers = #tpu.dot_dimension_numbers<[1], [1], [0], [0], [0, 0, 1, 0], [], []>} : vector<16x16xbf16>, vector<16x16xbf16>, vector<16x16xf32> -> vector<16x16xf32>
    %244 = arith.addf %243, %72 : vector<16x16xf32>
    %cst_86 = arith.constant dense<0xFF800000> : vector<16xf32>
    %245 = vector.multi_reduction <maximumf>, %244, %cst_86 [1] : vector<16x16xf32> to vector<16xf32>
    %246 = vector.shape_cast %245 : vector<16xf32> to vector<16x1xf32>
    %247 = vector.broadcast %246 : vector<16x1xf32> to vector<16x16xf32>
    %248 = arith.subf %244, %247 : vector<16x16xf32>
    %249 = math.exp %248 : vector<16x16xf32>
    %cst_87 = arith.constant dense<0.000000e+00> : vector<16xf32>
    %250 = vector.multi_reduction <add>, %249, %cst_87 [1] : vector<16x16xf32> to vector<16xf32>
    %251 = vector.shape_cast %250 : vector<16xf32> to vector<16x1xf32>
    %252 = vector.broadcast %251 : vector<16x1xf32> to vector<16x16xf32>
    %253 = arith.divf %249, %252 : vector<16x16xf32>
    %254 = arith.truncf %253 : vector<16x16xf32> to vector<16x16xbf16>
    %cst_88 = arith.constant dense<0.000000e+00> : vector<16x16xf32>
    %255 = tpu.matmul %254, %242, %cst_88 {dimension_numbers = #tpu.dot_dimension_numbers<[1], [0], [0], [1], [0, 0, 1, 1], [], []>} : vector<16x16xbf16>, vector<16x16xbf16>, vector<16x16xf32> -> vector<16x16xf32>
    %256 = arith.truncf %255 : vector<16x16xf32> to vector<16x16xbf16>
    %257 = vector.extract_strided_slice %211 {offsets = [16, 0], sizes = [16, 32], strides = [1, 1]} : vector<32x32xbf16> to vector<16x32xbf16>
    %cst_89 = arith.constant dense<0.000000e+00> : vector<16x32xf32>
    %258 = tpu.matmul %256, %257, %cst_89 {dimension_numbers = #tpu.dot_dimension_numbers<[1], [0], [0], [1], [0, 0, 1, 1], [], []>} : vector<16x16xbf16>, vector<16x32xbf16>, vector<16x32xf32> -> vector<16x32xf32>
    %259 = arith.addf %236, %258 : vector<16x32xf32>
    %260 = arith.addf %259, %202 : vector<16x32xf32>
    %c18 = arith.constant 18 : index
    %c0_90 = arith.constant 0 : index
    %261 = vector.load %arg7[%c18, %c0_90] : memref<24x128xf32, #tpu.memory_space<vmem>>, vector<1x32xf32>
    %c19 = arith.constant 19 : index
    %c0_91 = arith.constant 0 : index
    %262 = vector.load %arg7[%c19, %c0_91] : memref<24x128xf32, #tpu.memory_space<vmem>>, vector<1x32xf32>
    %cst_92 = arith.constant dense<0.000000e+00> : vector<16xf32>
    %263 = vector.multi_reduction <add>, %260, %cst_92 [1] : vector<16x32xf32> to vector<16xf32>
    %264 = vector.shape_cast %263 : vector<16xf32> to vector<16x1xf32>
    %cst_93 = arith.constant 3.200000e+01 : f32
    %265 = vector.broadcast %cst_93 : f32 to vector<16x1xf32>
    %266 = arith.divf %264, %265 : vector<16x1xf32>
    %267 = vector.broadcast %266 : vector<16x1xf32> to vector<16x32xf32>
    %268 = arith.subf %260, %267 : vector<16x32xf32>
    %269 = arith.mulf %268, %268 : vector<16x32xf32>
    %cst_94 = arith.constant dense<0.000000e+00> : vector<16xf32>
    %270 = vector.multi_reduction <add>, %269, %cst_94 [1] : vector<16x32xf32> to vector<16xf32>
    %271 = vector.shape_cast %270 : vector<16xf32> to vector<16x1xf32>
    %cst_95 = arith.constant 3.200000e+01 : f32
    %272 = vector.broadcast %cst_95 : f32 to vector<16x1xf32>
    %273 = arith.divf %271, %272 : vector<16x1xf32>
    %cst_96 = arith.constant 9.99999996E-13 : f32
    %274 = vector.broadcast %cst_96 : f32 to vector<16x1xf32>
    %275 = arith.addf %273, %274 : vector<16x1xf32>
    %276 = math.rsqrt %275 : vector<16x1xf32>
    %277 = vector.broadcast %276 : vector<16x1xf32> to vector<16x32xf32>
    %278 = arith.mulf %268, %277 : vector<16x32xf32>
    %279 = vector.broadcast %261 : vector<1x32xf32> to vector<16x32xf32>
    %280 = arith.mulf %278, %279 : vector<16x32xf32>
    %281 = vector.broadcast %262 : vector<1x32xf32> to vector<16x32xf32>
    %282 = arith.addf %280, %281 : vector<16x32xf32>
    %283 = arith.truncf %282 : vector<16x32xf32> to vector<16x32xbf16>
    %c1_97 = arith.constant 1 : index
    %c0_98 = arith.constant 0 : index
    %c0_99 = arith.constant 0 : index
    %284 = vector.load %arg5[%c1_97, %c0_98, %c0_99] : memref<2x32x64xbf16, #tpu.memory_space<vmem>>, vector<1x32x64xbf16>
    %285 = vector.shape_cast %284 : vector<1x32x64xbf16> to vector<32x64xbf16>
    %cst_100 = arith.constant dense<0.000000e+00> : vector<16x64xf32>
    %286 = tpu.matmul %283, %285, %cst_100 {dimension_numbers = #tpu.dot_dimension_numbers<[1], [0], [0], [1], [0, 0, 1, 1], [], []>} : vector<16x32xbf16>, vector<32x64xbf16>, vector<16x64xf32> -> vector<16x64xf32>
    %c20 = arith.constant 20 : index
    %c0_101 = arith.constant 0 : index
    %287 = vector.load %arg7[%c20, %c0_101] : memref<24x128xf32, #tpu.memory_space<vmem>>, vector<1x64xf32>
    %288 = vector.broadcast %287 : vector<1x64xf32> to vector<16x64xf32>
    %289 = arith.addf %286, %288 : vector<16x64xf32>
    %cst_102 = arith.constant 5.000000e-01 : f32
    %290 = vector.broadcast %cst_102 : f32 to vector<16x64xf32>
    %291 = arith.mulf %290, %289 : vector<16x64xf32>
    %cst_103 = arith.constant 4.471500e-02 : f32
    %292 = vector.broadcast %cst_103 : f32 to vector<16x64xf32>
    %293 = arith.mulf %292, %289 : vector<16x64xf32>
    %294 = arith.mulf %293, %289 : vector<16x64xf32>
    %295 = arith.mulf %294, %289 : vector<16x64xf32>
    %296 = arith.addf %289, %295 : vector<16x64xf32>
    %cst_104 = arith.constant 0.797884583 : f32
    %297 = vector.broadcast %cst_104 : f32 to vector<16x64xf32>
    %298 = arith.mulf %297, %296 : vector<16x64xf32>
    %299 = math.tanh %298 : vector<16x64xf32>
    %cst_105 = arith.constant 1.000000e+00 : f32
    %300 = vector.broadcast %cst_105 : f32 to vector<16x64xf32>
    %301 = arith.addf %300, %299 : vector<16x64xf32>
    %302 = arith.mulf %291, %301 : vector<16x64xf32>
    %303 = arith.truncf %302 : vector<16x64xf32> to vector<16x64xbf16>
    %c1_106 = arith.constant 1 : index
    %c0_107 = arith.constant 0 : index
    %c0_108 = arith.constant 0 : index
    %304 = vector.load %arg6[%c1_106, %c0_107, %c0_108] : memref<2x64x32xbf16, #tpu.memory_space<vmem>>, vector<1x64x32xbf16>
    %305 = vector.shape_cast %304 : vector<1x64x32xbf16> to vector<64x32xbf16>
    %cst_109 = arith.constant dense<0.000000e+00> : vector<16x32xf32>
    %306 = tpu.matmul %303, %305, %cst_109 {dimension_numbers = #tpu.dot_dimension_numbers<[1], [0], [0], [1], [0, 0, 1, 1], [], []>} : vector<16x64xbf16>, vector<64x32xbf16>, vector<16x32xf32> -> vector<16x32xf32>
    %c21 = arith.constant 21 : index
    %c0_110 = arith.constant 0 : index
    %307 = vector.load %arg7[%c21, %c0_110] : memref<24x128xf32, #tpu.memory_space<vmem>>, vector<1x32xf32>
    %308 = vector.broadcast %307 : vector<1x32xf32> to vector<16x32xf32>
    %309 = arith.addf %306, %308 : vector<16x32xf32>
    %310 = arith.addf %309, %282 : vector<16x32xf32>
    %c22 = arith.constant 22 : index
    %c0_111 = arith.constant 0 : index
    %311 = vector.load %arg7[%c22, %c0_111] : memref<24x128xf32, #tpu.memory_space<vmem>>, vector<1x32xf32>
    %c23 = arith.constant 23 : index
    %c0_112 = arith.constant 0 : index
    %312 = vector.load %arg7[%c23, %c0_112] : memref<24x128xf32, #tpu.memory_space<vmem>>, vector<1x32xf32>
    %cst_113 = arith.constant dense<0.000000e+00> : vector<16xf32>
    %313 = vector.multi_reduction <add>, %310, %cst_113 [1] : vector<16x32xf32> to vector<16xf32>
    %314 = vector.shape_cast %313 : vector<16xf32> to vector<16x1xf32>
    %cst_114 = arith.constant 3.200000e+01 : f32
    %315 = vector.broadcast %cst_114 : f32 to vector<16x1xf32>
    %316 = arith.divf %314, %315 : vector<16x1xf32>
    %317 = vector.broadcast %316 : vector<16x1xf32> to vector<16x32xf32>
    %318 = arith.subf %310, %317 : vector<16x32xf32>
    %319 = arith.mulf %318, %318 : vector<16x32xf32>
    %cst_115 = arith.constant dense<0.000000e+00> : vector<16xf32>
    %320 = vector.multi_reduction <add>, %319, %cst_115 [1] : vector<16x32xf32> to vector<16xf32>
    %321 = vector.shape_cast %320 : vector<16xf32> to vector<16x1xf32>
    %cst_116 = arith.constant 3.200000e+01 : f32
    %322 = vector.broadcast %cst_116 : f32 to vector<16x1xf32>
    %323 = arith.divf %321, %322 : vector<16x1xf32>
    %cst_117 = arith.constant 9.99999996E-13 : f32
    %324 = vector.broadcast %cst_117 : f32 to vector<16x1xf32>
    %325 = arith.addf %323, %324 : vector<16x1xf32>
    %326 = math.rsqrt %325 : vector<16x1xf32>
    %327 = vector.broadcast %326 : vector<16x1xf32> to vector<16x32xf32>
    %328 = arith.mulf %318, %327 : vector<16x32xf32>
    %329 = vector.broadcast %311 : vector<1x32xf32> to vector<16x32xf32>
    %330 = arith.mulf %328, %329 : vector<16x32xf32>
    %331 = vector.broadcast %312 : vector<1x32xf32> to vector<16x32xf32>
    %332 = arith.addf %330, %331 : vector<16x32xf32>
    %333 = vector.extract_strided_slice %332 {offsets = [0, 0], sizes = [1, 32], strides = [1, 1]} : vector<16x32xf32> to vector<1x32xf32>
    %334 = vector.extract_strided_slice %332 {offsets = [8, 0], sizes = [1, 32], strides = [1, 1]} : vector<16x32xf32> to vector<1x32xf32>
    %335 = tpu.concatenate %333, %334 in 0 : vector<1x32xf32>, vector<1x32xf32> -> vector<2x32xf32>
    %c2 = arith.constant 2 : index
    %c0_118 = arith.constant 0 : index
    %336 = vector.load %arg7[%c2, %c0_118] : memref<24x128xf32, #tpu.memory_space<vmem>>, vector<1x32xf32>
    %c3 = arith.constant 3 : index
    %c0_119 = arith.constant 0 : index
    %337 = vector.load %arg7[%c3, %c0_119] : memref<24x128xf32, #tpu.memory_space<vmem>>, vector<1x32xf32>
    %cst_120 = arith.constant dense<0.000000e+00> : vector<2xf32>
    %338 = vector.multi_reduction <add>, %335, %cst_120 [1] : vector<2x32xf32> to vector<2xf32>
    %339 = vector.shape_cast %338 : vector<2xf32> to vector<2x1xf32>
    %cst_121 = arith.constant 3.200000e+01 : f32
    %340 = vector.broadcast %cst_121 : f32 to vector<2x1xf32>
    %341 = arith.divf %339, %340 : vector<2x1xf32>
    %342 = vector.broadcast %341 : vector<2x1xf32> to vector<2x32xf32>
    %343 = arith.subf %335, %342 : vector<2x32xf32>
    %344 = arith.mulf %343, %343 : vector<2x32xf32>
    %cst_122 = arith.constant dense<0.000000e+00> : vector<2xf32>
    %345 = vector.multi_reduction <add>, %344, %cst_122 [1] : vector<2x32xf32> to vector<2xf32>
    %346 = vector.shape_cast %345 : vector<2xf32> to vector<2x1xf32>
    %cst_123 = arith.constant 3.200000e+01 : f32
    %347 = vector.broadcast %cst_123 : f32 to vector<2x1xf32>
    %348 = arith.divf %346, %347 : vector<2x1xf32>
    %cst_124 = arith.constant 9.99999974E-6 : f32
    %349 = vector.broadcast %cst_124 : f32 to vector<2x1xf32>
    %350 = arith.addf %348, %349 : vector<2x1xf32>
    %351 = math.rsqrt %350 : vector<2x1xf32>
    %352 = vector.broadcast %351 : vector<2x1xf32> to vector<2x32xf32>
    %353 = arith.mulf %343, %352 : vector<2x32xf32>
    %354 = vector.broadcast %336 : vector<1x32xf32> to vector<2x32xf32>
    %355 = arith.mulf %353, %354 : vector<2x32xf32>
    %356 = vector.broadcast %337 : vector<1x32xf32> to vector<2x32xf32>
    %357 = arith.addf %355, %356 : vector<2x32xf32>
    %c5 = arith.constant 5 : index
    %c0_125 = arith.constant 0 : index
    %358 = vector.load %arg7[%c5, %c0_125] : memref<24x128xf32, #tpu.memory_space<vmem>>, vector<3x32xf32>
    %359 = arith.truncf %357 : vector<2x32xf32> to vector<2x32xbf16>
    %360 = arith.truncf %358 : vector<3x32xf32> to vector<3x32xbf16>
    %cst_126 = arith.constant dense<0.000000e+00> : vector<2x3xf32>
    %361 = tpu.matmul %359, %360, %cst_126 {dimension_numbers = #tpu.dot_dimension_numbers<[1], [1], [0], [0], [0, 0, 1, 0], [], []>} : vector<2x32xbf16>, vector<3x32xbf16>, vector<2x3xf32> -> vector<2x3xf32>
    %c4 = arith.constant 4 : index
    %c0_127 = arith.constant 0 : index
    %362 = vector.load %arg7[%c4, %c0_127] : memref<24x128xf32, #tpu.memory_space<vmem>>, vector<1x3xf32>
    %363 = vector.broadcast %362 : vector<1x3xf32> to vector<2x3xf32>
    %364 = arith.addf %361, %363 : vector<2x3xf32>
    %cst_128 = arith.constant 0.000000e+00 : f32
    %365 = vector.broadcast %cst_128 : f32 to vector<8x128xf32>
    %c0_129 = arith.constant 0 : index
    %c0_130 = arith.constant 0 : index
    %366 = vector.load %arg8[%c0_129, %c0_130] : memref<8x128xf32, #tpu.memory_space<vmem>>, vector<8x128xf32>
    tpu.vector_store %arg8[%c0_129, %c0_130], %365 {strides = array<i32>} : memref<8x128xf32, #tpu.memory_space<vmem>>, vector<8x128xf32>,
    %c0_131 = arith.constant 0 : index
    %c0_132 = arith.constant 0 : index
    %367 = vector.load %arg8[%c0_131, %c0_132] : memref<8x128xf32, #tpu.memory_space<vmem>>, vector<2x3xf32>
    tpu.vector_store %arg8[%c0_131, %c0_132], %364 {strides = array<i32>} : memref<8x128xf32, #tpu.memory_space<vmem>>, vector<2x3xf32>,
    %c0_133 = arith.constant 0 : index
    %c32 = arith.constant 32 : index
    %368 = vector.load %arg8[%c0_133, %c32] : memref<8x128xf32, #tpu.memory_space<vmem>>, vector<2x32xf32>
    tpu.vector_store %arg8[%c0_133, %c32], %335 {strides = array<i32>} : memref<8x128xf32, #tpu.memory_space<vmem>>, vector<2x32xf32>,
    return
  }
}

</mosaic_0001>

<bundles_post_ra>
// kernel: forward.1
= control target key start
LH: loop header
LB: loop body
LE: loop exit
PB: predicated region body
PF: predicated region fallthrough
CT: control target
= control target key end

     0   :  { %v2091_v0 = vmov 0   ;;  %v2092_v2 = vmov 0.0   ;;  %vm2093_vm0 = vmmov 0   ;;  %vm115_vm1 = vcmask 1041408   ;;  %s2094_s11 = smov 96   ;;  %s2095_s12 = smov 80   ;;  %s2520_s0 = inlined_call_operand.vmem [shape: s32[16,1], index: 0, kind: input, shape index: {}]   ;;  %s2521_s2 = inlined_call_operand.vmem [shape: bf16[116,32], index: 2, kind: input, shape index: {}]   ;;  %s2522_s3 = inlined_call_operand.vmem [shape: bf16[2,32,96], index: 3, kind: input, shape index: {}]   ;;  %s2523_s7 = inlined_call_operand.vmem [shape: f32[24,128], index: 7, kind: input, shape index: {}]   ;;  %s2524_s1 = inlined_call_operand.vmem [shape: f32[1,16], index: 1, kind: input, shape index: {}]   ;;  %s2525_s4 = inlined_call_operand.vmem [shape: bf16[2,32,32], index: 4, kind: input, shape index: {}]   ;;  %s2526_s5 = inlined_call_operand.vmem [shape: bf16[2,32,64], index: 5, kind: input, shape index: {}]   ;;  %s2527_s6 = inlined_call_operand.vmem [shape: bf16[2,64,32], index: 6, kind: input, shape index: {}]   ;;  %s2528_s8 = inlined_call_operand.vmem [shape: f32[8,128], index: 8, kind: output, shape index: {}]  }
   0x1   :  { %2000 = vset.pattern.permute.xlu0 %v2091_v0  ;;  %v30_v1 = vld [vmem:[%s2520_s0] sm:$0xff]  ;;  %1836 = vmatprep.subr.bf16.mxu0 %v2092_v2  ;;  %v31_v4 = vld [vmem:[%s2520_s0 + $0x8] sm:$0xff]  ;;  %v2003_v6 = vld [vmem:[%s2521_s2 + $0x10] sm:$0xff]   ;;  %v32_v13 = vlaneseq  ;;  %vm111_vm7 = vcmask 949248   ;;  %vm162_vm8 = vcmask 261120   ;;  %s2096_s13 = smov 112   ;;  %1677 = vst [vmem:[%s2528_s8] sm:$0xff] %v2092_v2 }
   0x2   :  { %38 = vperm.xlu0 %2000, %v30_v1   ;;  %v2001_v3 = vld [vmem:[%s2521_s2] sm:$0xff]   ;;  %1856 = vmatprep.subr.bf16.mxu1 %v2092_v2  ;;  %v2002_v5 = vld [vmem:[%s2521_s2 + $0x8] sm:$0xff]   ;;  %v2004_v7 = vld [vmem:[%s2521_s2 + $0x18] sm:$0xff]   ;;  %vm315_vm9 = vcmask 130048   ;;  %s2099_s15 = smov 48   ;;  %vm828_vm14 = vcmask 523264  }
   0x3   :  { %1837 = vmatpush3.bf16.msra.mxu0 %v2001_v3  ;;  %1852 = vmatprep.mubr.msk.bf16.mxu0 %vm2093_vm0, %v2092_v2  ;;  %v2005_v8 = vld [vmem:[%s2521_s2 + $0x20] sm:$0xff]   ;;  %v2006_v9 = vld [vmem:[%s2521_s2 + $0x28] sm:$0xff]   ;;  %v2007_v10 = vld [vmem:[%s2521_s2 + $0x30] sm:$0xff]   ;;  %v2190_v14 = vshrl.u32 %v32_v13, 7  ;;  %v2192_v15 = vand.u32 127, %v32_v13  ;;  %vm1595_vm15 = vcmask 1040384  }
   0x4   :  { %1838 = vmatprep.subr.bf16.mxu0 %v2092_v2  ;;  %1860 = vmatprep.mubr.msk.bf16.mxu1 %vm2093_vm0, %v2092_v2  ;;  %v2008_v11 = vld [vmem:[%s2521_s2 + $0x38] ss:$0 sps:$4 sm:$0x33]   ;;  %v2009_v38 = vld [vmem:[%s2522_s3] sm:$0xff]   ;;  %v2010_v39 = vld [vmem:[%s2522_s3 + $0x8] sm:$0xff]  }
   0x5   :  { %v117_v12 = vsel %vm115_vm1, %v2008_v11, 0  ;;  %v36_v16 = vadd.s32 100, %v2190_v14  ;;  %1857 = vmatpush3.bf16.msra.mxu1 %v2009_v38  ;;  %v1699_v48 = vld [vmem:[%s2523_s7] ss:$0 sm:$0xff]  ;;  %v1700_v52 = vld [vmem:[%s2523_s7 + $0x1] ss:$0 sm:$0xff] }
   0x6   :  { %41 = vperm.xlu0 %2000, %v31_v4   ;;  %1858 = vmatprep.subr.bf16.mxu1 %v2092_v2  ;;  %v1701_v57 = vld [vmem:[%s2523_s7 + $0x8] ss:$0 sm:$0xff]  ;;  %vm223_vm10 = vcmp.ge.s32.totalorder %v2192_v15, 8  ;;  %vm224_vm11 = vcmp.lt.s32.totalorder %v2192_v15, 16  ;;  %vm213_vm12 = vcmp.lt.s32.totalorder %v2192_v15, 8  ;;  %vm1678_vm1 = vcmask 17408  }
   0x7   :  { %1839 = vmatpush3.bf16.msra.mxu0 %v2002_v5  ;;  %vm45_vm2 = vcmp.eq.s32.totalorder %v2192_v15, %v36_v16  ;;  %vm225_vm13 = vmand %vm223_vm10, %vm224_vm11 }
   0x8   :  { %1840 = vmatprep.subr.bf16.mxu0 %v2092_v2 }
   0x9   :  { %1859 = vmatpush3.bf16.msra.mxu1 %v2010_v39 }
   0xa   :  { %1864 = vmatprep.subr.bf16.mxu1 %v2092_v2 }
   0xb   :  { %1841 = vmatpush3.bf16.msra.mxu0 %v2003_v6 }
   0xc   :  { %1842 = vmatprep.subr.bf16.mxu0 %v2092_v2 }
   0xf   :  { %1843 = vmatpush3.bf16.msra.mxu0 %v2004_v7  ;;  %v202_v7 = vld [vmem:[%s2524_s1] sm:$0x1]  ;;  %s2098_s1 = smov 64  }
  0x10   :  { %1844 = vmatprep.subr.bf16.mxu0 %v2092_v2 }
  0x13   :  { %1845 = vmatpush3.bf16.msra.mxu0 %v2005_v8  ;;  %v203_v8 = vsub.f32 1.0, %v202_v7 }
  0x14   :  { %1846 = vmatprep.subr.bf16.mxu0 %v2092_v2 }
  0x17   :  { %1847 = vmatpush3.bf16.msra.mxu0 %v2006_v9  ;;  %v235_v9 = vsub.s32 0, %v2190_v14 }
  0x18   :  { %1848 = vmatprep.subr.bf16.mxu0 %v2092_v2 }
  0x1b   :  { %1849 = vmatpush3.bf16.msra.mxu0 %v2007_v10  ;;  %v204_v10 = vmul.f32 -1e+09, %v203_v8 }
  0x1c   :  { %1850 = vmatprep.subr.bf16.mxu0 %v2092_v2 }
  0x1d   :  { %v236_v11 = vrot.slane %v204_v10, %v235_v9 }
  0x1f   :  { %1851 = vmatpush3.bf16.msra.mxu0 %v117_v12  ;;  %v2097_v12 = vmov -1e+09  }
  0x20   :  { %1882 = vmatprep.subr.bf16.mxu0 %v2092_v2  ;;  %v230_v13 = vsel %vm213_vm12, 0.0, %v2097_v12  ;;  %v231_v16 = vsel %vm225_vm13, 0.0, %v2097_v12 }
  0x81   :  { %v39_v17 = vpop.permute.xlu0 %38 }
  0x82   :  { %vm43_vm3 = vcmp.eq.s32.totalorder %v2192_v15, %v39_v17  ;;  %v2258_v17 = vadd.f32 %v236_v11, %v230_v13 }
  0x83   :  { %vm46_vm4 = vmor %vm43_vm3, %vm45_vm2 }
  0x84   :  { %v48_v19 = vsel %vm46_vm4, 1.0, %v2092_v2 }
  0x85   :  { %v42_v18 = vpop.permute.xlu0 %41 }
  0x86   :  { %vm44_vm5 = vcmp.eq.s32.totalorder %v2192_v15, %v42_v18  ;;  %v2260_v18 = vadd.f32 %v236_v11, %v231_v16  ;;  %v2012_v16 = vld [vmem:[%s2525_s4 + $0x8] sm:$0xff]  }
  0x87   :  { %vm47_vm6 = vmor %vm44_vm5, %vm45_vm2  ;;  %vm1684_vm2 = vcmask 517376  }
  0x88   :  { %v49_v20 = vsel %vm47_vm6, 1.0, %v2092_v2 }
  0x89   :  { %v50_v21 = vpack.c.bf16 %v49_v20, %v48_v19 }
  0x8b   :  { %1853 = vmatmul.mubr.msk.bf16.vlgmr.msra.gmra.mrb[0].mxu0 %vm111_vm7, %v50_v21 }
  0x8c   :  { %1884 = vmatprep.mubr.msk.bf16.mxu0 %vm2093_vm0, %v2092_v2 }
 0x15e   :  { %v153_v22 = vpop.f32.mrb[0].mxu0 }
 0x15f   :  { %v1854_v23 = vpop.f32.mrb[1].mxu0  ;;  %v163_v24 = vsel %vm162_vm8, %v153_v22, 0.0 }
 0x160   :  { %164 = vadd.xlane.f32.xlu1 %v163_v24  ;;  %v156_v25 = vpop.f32.mrb[2].mxu0 }
 0x161   :  { %v1855_v26 = vpop.f32.mrb[3].mxu0  ;;  %v166_v27 = vsel %vm162_vm8, %v156_v25, 0.0 }
 0x164   :  { %167 = vadd.xlane.f32.xlu1 %v166_v27 }
 0x1ed   :  { %v165_v28 = vpop.xlane.xlu1 %164 }
 0x1ee   :  { %v170_v29 = vmul.f32 0.03125, %v165_v28 }
 0x1f0   :  { %v172_v30 = vsub.f32 %v153_v22, %v170_v29 }
 0x1f1   :  { %v168_v31 = vpop.xlane.xlu1 %167 }
 0x1f2   :  { %v171_v32 = vmul.f32 0.03125, %v168_v31  ;;  %v174_v33 = vmul.f32 %v172_v30, %v172_v30 }
 0x1f4   :  { %v173_v34 = vsub.f32 %v156_v25, %v171_v32  ;;  %v176_v35 = vsel %vm162_vm8, %v174_v33, 0.0 }
 0x1f5   :  { %177 = vadd.xlane.f32.xlu0 %v176_v35 }
 0x1f6   :  { %v175_v36 = vmul.f32 %v173_v34, %v173_v34 }
 0x1f8   :  { %v179_v37 = vsel %vm162_vm8, %v175_v36, 0.0 }
 0x1f9   :  { %180 = vadd.xlane.f32.xlu1 %v179_v37 }
 0x282   :  { %v178_v40 = vpop.xlane.xlu0 %177 }
 0x283   :  { %v182_v41 = vmul.f32 0.03125, %v178_v40 }
 0x285   :  { %v184_v42 = vadd.f32 1e-12, %v182_v41 }
 0x286   :  { %v181_v43 = vpop.xlane.xlu1 %180 }
 0x287   :  { %2029 = vrsqrt.f32 %v184_v42  ;;  %v183_v44 = vmul.f32 0.03125, %v181_v43 }
 0x289   :  { %v185_v45 = vadd.f32 1e-12, %v183_v44 }
 0x28b   :  { %2031 = vrsqrt.f32 %v185_v45 }
 0x291   :  { %v2030_v46 = vpop.eup %2029 }
 0x292   :  { %v188_v47 = vmul.f32 %v2030_v46, %v172_v30 }
 0x294   :  { %v194_v51 = vmul.f32 %v1699_v48, %v188_v47 }
 0x295   :  { %v2032_v49 = vpop.eup %2031 }
 0x296   :  { %v189_v50 = vmul.f32 %v2032_v49, %v173_v34  ;;  %v2220_v54 = vadd.f32 %v1700_v52, %v194_v51 }
 0x298   :  { %v195_v53 = vmul.f32 %v1699_v48, %v189_v50 }
 0x29a   :  { %v2222_v55 = vadd.f32 %v1700_v52, %v195_v53 }
 0x29c   :  { %v240_v56 = vpack.c.bf16 %v2222_v55, %v2220_v54 }
 0x29e   :  { %1861 = vmatmul.mubr.msk.bf16.vlgmr.msra.gmra.mrb[0].mxu1 %vm162_vm8, %v240_v56 }
 0x29f   :  { %1866 = vmatprep.mubr.msk.bf16.mxu1 %vm2093_vm0, %v2092_v2 }
 0x371   :  { %v299_v58 = vpop.f32.mrb[0].mxu1 }
 0x372   :  { %v1862_v59 = vpop.f32.mrb[1].mxu1  ;;  %v300_v61 = vadd.f32 %v1701_v57, %v299_v58 }
 0x373   :  { %v302_v60 = vpop.f32.mrb[2].mxu1 }
 0x374   :  { %v303_v62 = vadd.f32 %v1701_v57, %v302_v60  ;;  %v1863_v63 = vpop.f32.mrb[3].mxu1 }
 0x375   :  { %v2011_v63 = vld [vmem:[%s2525_s4] sm:$0xff]  }
 0x376   :  { %v2232_v0 = vpack.c.bf16 %v303_v62, %v300_v61 }
 0x378   :  { %313 = vrot.lane.b32.xlu1 %v2232_v0, %s2094_s11 }
 0x37c   :  { %492 = vrot.lane.b32.xlu1 %v2232_v0, %s2095_s12 }
 0x380   :  { %490 = vrot.lane.b32.xlu1 %v2232_v0, %s2096_s13 }
 0x3ea   :  { %v314_v1 = vpop.permute.xlu1 %313 }
 0x3eb   :  { %v320_v3 = vsel %vm315_vm9, %v314_v1, 0 }
 0x3ec   :  { %1865 = vmatpush3.bf16.xpose.msra.mxu1 %v320_v3 }
 0x3ed   :  { %1870 = vmatprep.subr.bf16.mxu1 %v2092_v2 }
 0x3ee   :  { %v493_v4 = vpop.permute.xlu1 %492 }
 0x3ef   :  { %v498_v5 = vsel %vm315_vm9, %v493_v4, 0 }
 0x3f0   :  { %1883 = vmatpush3.bf16.xpose.msra.mxu0 %v498_v5 }
 0x3f1   :  { %1894 = vmatprep.subr.bf16.mxu0 %v2092_v2 }
 0x3f2   :  { %v491_v6 = vpop.permute.xlu1 %490 }
 0x3f3   :  { %1867 = vmatmul.mubr.msk.bf16.vlgmr.msra.gmra.mrb[4].mxu1 %vm315_vm9, %v2232_v0 }
 0x3f4   :  { %1872 = vmatprep.mubr.msk.bf16.mxu1 %vm2093_vm0, %v2092_v2 }
 0x3f7   :  { %1885 = vmatmul.mubr.msk.bf16.vlgmr.msra.gmra.mrb[4].mxu0 %vm315_vm9, %v491_v6 }
 0x3f8   :  { %1896 = vmatprep.mubr.msk.bf16.mxu0 %vm2093_vm0, %v2092_v2  ;;  %1895 = vmatpush3.bf16.msra.mxu0 %v2012_v16 }
 0x3f9   :  { %1908 = vmatprep.subr.bf16.mxu0 %v2092_v2 }
 0x4c6   :  { %v356_v19 = vpop.f32.mrb[4].mxu1 }
 0x4c7   :  { %v357_v20 = vadd.f32 %v356_v19, %v2258_v17  ;;  %v1868_v14 = vpop.f32.mrb[5].mxu1 }
 0x4c8   :  { %v359_v21 = vpop.f32.mrb[6].mxu1 }
 0x4c9   :  { %v360_v22 = vadd.f32 %v359_v21, %v2260_v18  ;;  %v1869_v23 = vpop.f32.mrb[7].mxu1  ;;  %v363_v24 = vsel %vm315_vm9, %v357_v20, -inf }
 0x4ca   :  { %364 = vmax.xlane.f32.xlu1 %v363_v24  ;;  %v534_v15 = vpop.f32.mrb[4].mxu0 }
 0x4cb   :  { %v1886_v25 = vpop.f32.mrb[5].mxu0  ;;  %v366_v26 = vsel %vm315_vm9, %v360_v22, -inf  ;;  %v535_v41 = vadd.f32 %v534_v15, %v2258_v17 }
 0x4cc   :  { %367 = vmax.xlane.f32.xlu0 %v366_v26  ;;  %v537_v27 = vpop.f32.mrb[6].mxu0  ;;  %v1709_v26 = vld [vmem:[%s2523_s7 + $0x9] ss:$0 sm:$0xff] }
 0x4cd   :  { %v538_v28 = vadd.f32 %v537_v27, %v2260_v18  ;;  %v1887_v29 = vpop.f32.mrb[7].mxu0  ;;  %v541_v42 = vsel %vm315_vm9, %v535_v41, -inf }
 0x4cf   :  { %v544_v30 = vsel %vm315_vm9, %v538_v28, -inf }
 0x4d0   :  { %545 = vmax.xlane.f32.xlu1 %v544_v30 }
 0x557   :  { %v365_v31 = vpop.xlane.xlu1 %364 }
 0x558   :  { %v369_v32 = vsub.f32 %v357_v20, %v365_v31 }
 0x559   :  { %v368_v33 = vpop.xlane.xlu0 %367 }
 0x55a   :  { %v371_v34 = vmul.f32 1.442695, %v369_v32  ;;  %v370_v35 = vsub.f32 %v360_v22, %v368_v33 }
 0x55c   :  { %2033 = vpow2.f32 %v371_v34  ;;  %v373_v36 = vmul.f32 1.442695, %v370_v35 }
 0x55d   :  { %v546_v51 = vpop.xlane.xlu1 %545 }
 0x55e   :  { %2035 = vpow2.f32 %v373_v36  ;;  %v548_v52 = vsub.f32 %v538_v28, %v546_v51 }
 0x560   :  { %v551_v57 = vmul.f32 1.442695, %v548_v52 }
 0x566   :  { %v2034_v37 = vpop.eup %2033 }
 0x567   :  { %v375_v38 = vsel %vm315_vm9, %v2034_v37, 0.0 }
 0x568   :  { %v2036_v39 = vpop.eup %2035  ;;  %376 = vadd.xlane.f32.xlu0 %v375_v38 }
 0x569   :  { %v378_v40 = vsel %vm315_vm9, %v2036_v39, 0.0 }
 0x56c   :  { %379 = vadd.xlane.f32.xlu0 %v378_v40 }
 0x582   :  { %386 = vrot.lane.b32.xlu0 %v2232_v0, %s2098_s1 }
 0x5a1   :  { %542 = vmax.xlane.f32.xlu0 %v541_v42 }
 0x5f5   :  { %v377_v43 = vpop.xlane.xlu0 %376 }
 0x5f6   :  { %2037 = vrcp.f32 %v377_v43 }
 0x5f9   :  { %v380_v44 = vpop.xlane.xlu0 %379 }
 0x5fa   :  { %2039 = vrcp.f32 %v380_v44 }
 0x5fd   :  { %v387_v45 = vpop.permute.xlu0 %386 }
 0x5fe   :  { %1871 = vmatpush3.bf16.msra.mxu1 %v387_v45 }
 0x5ff   :  { %1876 = vmatprep.subr.bf16.mxu1 %v2092_v2 }
 0x600   :  { %v2038_v46 = vpop.eup %2037 }
 0x601   :  { %v382_v48 = vmul.f32 %v2038_v46, %v2034_v37 }
 0x604   :  { %v2040_v47 = vpop.eup %2039 }
 0x605   :  { %v384_v49 = vmul.f32 %v2040_v47, %v2036_v39 }
 0x607   :  { %v385_v50 = vpack.c.bf16 %v384_v49, %v382_v48  ;;  %v2014_v48 = vld [vmem:[%s2526_s5 + $0x8] sm:$0xff]  }
 0x609   :  { %1873 = vmatmul.mubr.msk.bf16.vlgmr.msra.gmra.mrb[8].mxu1 %vm315_vm9, %v385_v50 }
 0x60a   :  { %1878 = vmatprep.mubr.msk.bf16.mxu1 %vm2093_vm0, %v2092_v2  ;;  %1877 = vmatpush3.bf16.msra.mxu1 %v2011_v63  ;;  %v1715_v63 = vld [vmem:[%s2523_s7 + $0xb] ss:$0 sm:$0xff] }
 0x60b   :  { %1888 = vmatprep.subr.bf16.mxu1 %v2092_v2 }
 0x62e   :  { %v543_v53 = vpop.xlane.xlu0 %542 }
 0x62f   :  { %v547_v56 = vsub.f32 %v535_v41, %v543_v53 }
 0x631   :  { %v549_v58 = vmul.f32 1.442695, %v547_v56 }
 0x633   :  { %2041 = vpow2.f32 %v549_v58 }
 0x634   :  { %2043 = vpow2.f32 %v551_v57 }
 0x63d   :  { %v2042_v59 = vpop.eup %2041 }
 0x63e   :  { %v553_v60 = vsel %vm315_vm9, %v2042_v59, 0.0  ;;  %v2044_v61 = vpop.eup %2043 }
 0x63f   :  { %554 = vadd.xlane.f32.xlu1 %v553_v60  ;;  %v556_v62 = vsel %vm315_vm9, %v2044_v61, 0.0 }
 0x643   :  { %557 = vadd.xlane.f32.xlu1 %v556_v62 }
 0x654   :  { %564 = vrot.lane.b32.xlu1 %v2232_v0, %s2099_s15 }
 0x6cc   :  { %v555_v1 = vpop.xlane.xlu1 %554 }
 0x6d0   :  { %v558_v3 = vpop.xlane.xlu1 %557 }
 0x6d1   :  { %2045 = vrcp.f32 %v558_v3 }
 0x6d2   :  { %2047 = vrcp.f32 %v555_v1 }
 0x6d4   :  { %v565_v10 = vpop.permute.xlu1 %564 }
 0x6db   :  { %v2046_v9 = vpop.eup %2045 }
 0x6dc   :  { %v426_v4 = vpop.f32.mrb[8].mxu1  ;;  %v2048_v0 = vpop.eup %2047  ;;  %v562_v11 = vmul.f32 %v2046_v9, %v2044_v61  ;;  %v2018_v9 = vld [vmem:[%s2527_s6 + $0x18] sm:$0xff]  }
 0x6dd   :  { %v1874_v5 = vpop.f32.mrb[9].mxu1  ;;  %v560_v12 = vmul.f32 %v2048_v0, %v2042_v59  ;;  %v1714_v59 = vld [vmem:[%s2523_s7 + $0xa] ss:$0 sm:$0xff] }
 0x6de   :  { %v429_v6 = vpop.f32.mrb[10].mxu1 }
 0x6df   :  { %v433_v7 = vpack.c.bf16 %v429_v6, %v426_v4  ;;  %v1875_v8 = vpop.f32.mrb[11].mxu1  ;;  %v563_v13 = vpack.c.bf16 %v562_v11, %v560_v12  ;;  %v2015_v6 = vld [vmem:[%s2527_s6] sm:$0xff]  }
 0x6e0   :  { %v2017_v8 = vld [vmem:[%s2527_s6 + $0x10] sm:$0xff]  }
 0x6e1   :  { %1879 = vmatmul.mubr.msk.bf16.vlgmr.msra.gmra.mrb[12].mxu1 %vm315_vm9, %v433_v7  ;;  %v2016_v7 = vld [vmem:[%s2527_s6 + $0x8] sm:$0xff]  }
 0x6e2   :  { %1889 = vmatpush3.bf16.msra.mxu1 %v565_v10  ;;  %1890 = vmatprep.mubr.msk.bf16.mxu1 %vm2093_vm0, %v2092_v2  ;;  %v1716_v10 = vld [vmem:[%s2523_s7 + $0xc] ss:$0 sm:$0xff] }
 0x6e3   :  { %1900 = vmatprep.subr.bf16.mxu1 %v2092_v2 }
 0x6e9   :  { %1891 = vmatmul.mubr.msk.bf16.vlgmr.msra.gmra.mrb[16].mxu1 %vm315_vm9, %v563_v13 }
 0x6ea   :  { %1904 = vmatprep.mubr.msk.bf16.mxu1 %vm2093_vm0, %v2092_v2 }
 0x7b4   :  { %v477_v19 = vpop.f32.mrb[12].mxu1 }
 0x7b5   :  { %v1880_v20 = vpop.f32.mrb[13].mxu1  ;;  %v488_v27 = vadd.f32 %v1709_v26, %v477_v19 }
 0x7b6   :  { %v480_v14 = vpop.f32.mrb[14].mxu1 }
 0x7b7   :  { %v1881_v21 = vpop.f32.mrb[15].mxu1  ;;  %v489_v29 = vadd.f32 %v1709_v26, %v480_v14 }
 0x7bc   :  { %v604_v22 = vpop.f32.mrb[16].mxu1 }
 0x7bd   :  { %v1892_v23 = vpop.f32.mrb[17].mxu1 }
 0x7be   :  { %v607_v24 = vpop.f32.mrb[18].mxu1 }
 0x7bf   :  { %v611_v15 = vpack.c.bf16 %v607_v24, %v604_v22  ;;  %v1893_v25 = vpop.f32.mrb[19].mxu1 }
 0x7c1   :  { %1897 = vmatmul.mubr.msk.bf16.vlgmr.msra.gmra.mrb[8].mxu0 %vm315_vm9, %v611_v15 }
 0x7c2   :  { %1916 = vmatprep.mubr.msk.bf16.mxu0 %vm2093_vm0, %v2092_v2  ;;  %1909 = vmatpush3.bf16.msra.mxu0 %v2015_v6  ;;  %v1726_v6 = vld [vmem:[%s2523_s7 + $0xe] ss:$0 sm:$0xff] }
 0x7c3   :  { %1910 = vmatprep.subr.bf16.mxu0 %v2092_v2 }
 0x7c6   :  { %1911 = vmatpush3.bf16.msra.mxu0 %v2016_v7 }
 0x7c7   :  { %1912 = vmatprep.subr.bf16.mxu0 %v2092_v2 }
 0x7ca   :  { %1913 = vmatpush3.bf16.msra.mxu0 %v2017_v8 }
 0x7cb   :  { %1914 = vmatprep.subr.bf16.mxu0 %v2092_v2 }
 0x7ce   :  { %1915 = vmatpush3.bf16.msra.mxu0 %v2018_v9 }
 0x7cf   :  { %1934 = vmatprep.subr.bf16.mxu0 %v2092_v2 }
 0x894   :  { %v655_v28 = vpop.f32.mrb[8].mxu0 }
 0x895   :  { %v662_v30 = vadd.f32 %v655_v28, %v488_v27  ;;  %v1898_v31 = vpop.f32.mrb[9].mxu0 }
 0x896   :  { %v658_v32 = vpop.f32.mrb[10].mxu0 }
 0x897   :  { %v663_v33 = vadd.f32 %v658_v32, %v489_v29  ;;  %v1899_v34 = vpop.f32.mrb[11].mxu0  ;;  %v664_v35 = vadd.f32 %v662_v30, %v2220_v54 }
 0x899   :  { %v668_v36 = vsel %vm162_vm8, %v664_v35, 0.0  ;;  %v665_v37 = vadd.f32 %v663_v33, %v2222_v55  ;;  %v2013_v55 = vld [vmem:[%s2526_s5] sm:$0xff]  }
 0x89a   :  { %669 = vadd.xlane.f32.xlu1 %v668_v36  ;;  %1901 = vmatpush3.bf16.msra.mxu1 %v2013_v55 }
 0x89b   :  { %v671_v38 = vsel %vm162_vm8, %v665_v37, 0.0  ;;  %1902 = vmatprep.subr.bf16.mxu1 %v2092_v2 }
 0x89c   :  { %672 = vadd.xlane.f32.xlu0 %v671_v38 }
 0x89e   :  { %1903 = vmatpush3.bf16.msra.mxu1 %v2014_v48 }
 0x89f   :  { %1920 = vmatprep.subr.bf16.mxu1 %v2092_v2 }
 0x927   :  { %v670_v39 = vpop.xlane.xlu1 %669 }
 0x928   :  { %v674_v40 = vmul.f32 0.03125, %v670_v39 }
 0x929   :  { %v673_v41 = vpop.xlane.xlu0 %672 }
 0x92a   :  { %v676_v42 = vsub.f32 %v664_v35, %v674_v40  ;;  %v675_v43 = vmul.f32 0.03125, %v673_v41 }
 0x92c   :  { %v677_v44 = vsub.f32 %v665_v37, %v675_v43  ;;  %v678_v45 = vmul.f32 %v676_v42, %v676_v42  ;;  %v1720_v37 = vld [vmem:[%s2523_s7 + $0xd] ss:$0 sm:$0xff] }
 0x92e   :  { %v680_v46 = vsel %vm162_vm8, %v678_v45, 0.0  ;;  %v679_v47 = vmul.f32 %v677_v44, %v677_v44 }
 0x92f   :  { %681 = vadd.xlane.f32.xlu0 %v680_v46 }
 0x930   :  { %v683_v54 = vsel %vm162_vm8, %v679_v47, 0.0 }
 0x933   :  { %684 = vadd.xlane.f32.xlu0 %v683_v54 }
 0x9bc   :  { %v682_v49 = vpop.xlane.xlu0 %681 }
 0x9bd   :  { %v686_v50 = vmul.f32 0.03125, %v682_v49 }
 0x9bf   :  { %v688_v51 = vadd.f32 1e-12, %v686_v50 }
 0x9c0   :  { %v685_v52 = vpop.xlane.xlu0 %684 }
 0x9c1   :  { %2049 = vrsqrt.f32 %v688_v51  ;;  %v687_v53 = vmul.f32 0.03125, %v685_v52 }
 0x9c3   :  { %v689_v56 = vadd.f32 1e-12, %v687_v53 }
 0x9c5   :  { %2051 = vrsqrt.f32 %v689_v56 }
 0x9cb   :  { %v2050_v57 = vpop.eup %2049 }
 0x9cc   :  { %v692_v58 = vmul.f32 %v2050_v57, %v676_v42 }
 0x9ce   :  { %v698_v61 = vmul.f32 %v1714_v59, %v692_v58  ;;  %v2019_v58 = vld [vmem:[%s2522_s3 + $0x10] sm:$0xff]  }
 0x9cf   :  { %v2052_v60 = vpop.eup %2051 }
 0x9d0   :  { %v693_v62 = vmul.f32 %v2052_v60, %v677_v44  ;;  %v704_v3 = vadd.f32 %v1715_v63, %v698_v61 }
 0x9d2   :  { %v699_v1 = vmul.f32 %v1714_v59, %v693_v62  ;;  %v2020_v59 = vld [vmem:[%s2522_s3 + $0x18] sm:$0xff]  }
 0x9d4   :  { %v705_v4 = vadd.f32 %v1715_v63, %v699_v1 }
 0x9d6   :  { %v706_v5 = vpack.c.bf16 %v705_v4, %v704_v3 }
 0x9d8   :  { %1905 = vmatmul.mubr.msk.bf16.vlgmr.msra.gmra.mrb[20].mxu1 %vm162_vm8, %v706_v5 }
 0x9d9   :  { %1924 = vmatprep.mubr.msk.bf16.mxu1 %vm2093_vm0, %v2092_v2  ;;  %1921 = vmatpush3.bf16.msra.mxu1 %v2019_v58 }
 0x9da   :  { %1922 = vmatprep.subr.bf16.mxu1 %v2092_v2 }
 0x9dd   :  { %1923 = vmatpush3.bf16.msra.mxu1 %v2020_v59 }
 0x9de   :  { %1928 = vmatprep.subr.bf16.mxu1 %v2092_v2 }
 0xaab   :  { %v765_v0 = vpop.f32.mrb[20].mxu1 }
 0xaac   :  { %v766_v11 = vadd.f32 %v1716_v10, %v765_v0  ;;  %v1906_v12 = vpop.f32.mrb[21].mxu1 }
 0xaad   :  { %v768_v13 = vpop.f32.mrb[22].mxu1 }
 0xaae   :  { %v774_v16 = vmul.f32 0.044715, %v766_v11  ;;  %v769_v19 = vadd.f32 %v1716_v10, %v768_v13  ;;  %v1907_v20 = vpop.f32.mrb[23].mxu1  ;;  %v772_v31 = vmul.f32 0.5, %v766_v11  ;;  %v1727_v10 = vld [vmem:[%s2523_s7 + $0xf] ss:$0 sm:$0xff] }
 0xab0   :  { %v776_v14 = vmul.f32 %v774_v16, %v766_v11  ;;  %v775_v21 = vmul.f32 0.044715, %v769_v19  ;;  %v773_v32 = vmul.f32 0.5, %v769_v19  ;;  %v1732_v16 = vld [vmem:[%s2523_s7 + $0x10] ss:$0 sm:$0xff] }
 0xab2   :  { %v778_v22 = vmul.f32 %v776_v14, %v766_v11  ;;  %v777_v23 = vmul.f32 %v775_v21, %v769_v19 }
 0xab4   :  { %v780_v24 = vadd.f32 %v778_v22, %v766_v11  ;;  %v779_v15 = vmul.f32 %v777_v23, %v769_v19 }
 0xab6   :  { %v782_v25 = vmul.f32 0.7978846, %v780_v24  ;;  %v781_v26 = vadd.f32 %v779_v15, %v769_v19 }
 0xab8   :  { %2053 = vtanh.f32 %v782_v25  ;;  %v783_v27 = vmul.f32 0.7978846, %v781_v26 }
 0xaba   :  { %2055 = vtanh.f32 %v783_v27 }
 0xac2   :  { %v2054_v28 = vpop.eup %2053 }
 0xac3   :  { %v786_v29 = vadd.f32 1.0, %v2054_v28 }
 0xac4   :  { %v2056_v30 = vpop.eup %2055 }
 0xac5   :  { %v787_v33 = vadd.f32 1.0, %v2056_v30  ;;  %v788_v34 = vmul.f32 %v786_v29, %v772_v31 }
 0xac7   :  { %v789_v35 = vmul.f32 %v787_v33, %v773_v32 }
 0xac9   :  { %v790_v36 = vpack.c.bf16 %v789_v35, %v788_v34 }
 0xacb   :  { %1917 = vmatmul.mubr.msk.bf16.vlgmr.msra.gmra.mrb[12].mxu0 %vm828_vm14, %v790_v36 }
 0xacc   :  { %1936 = vmatprep.mubr.msk.bf16.mxu0 %vm2093_vm0, %v2092_v2 }
 0xb9e   :  { %v866_v38 = vpop.f32.mrb[12].mxu0 }
 0xb9f   :  { %v867_v39 = vadd.f32 %v1720_v37, %v866_v38  ;;  %v1918_v40 = vpop.f32.mrb[13].mxu0 }
 0xba0   :  { %v869_v41 = vpop.f32.mrb[14].mxu0 }
 0xba1   :  { %v870_v42 = vadd.f32 %v1720_v37, %v869_v41  ;;  %v1919_v43 = vpop.f32.mrb[15].mxu0  ;;  %v873_v44 = vadd.f32 %v867_v39, %v704_v3 }
 0xba3   :  { %v877_v45 = vsel %vm162_vm8, %v873_v44, 0.0  ;;  %v874_v46 = vadd.f32 %v870_v42, %v705_v4 }
 0xba4   :  { %878 = vadd.xlane.f32.xlu0 %v877_v45 }
 0xba5   :  { %v880_v47 = vsel %vm162_vm8, %v874_v46, 0.0 }
 0xba8   :  { %881 = vadd.xlane.f32.xlu0 %v880_v47 }
 0xc31   :  { %v879_v54 = vpop.xlane.xlu0 %878 }
 0xc32   :  { %v883_v55 = vmul.f32 0.03125, %v879_v54 }
 0xc34   :  { %v885_v48 = vsub.f32 %v873_v44, %v883_v55 }
 0xc35   :  { %v882_v49 = vpop.xlane.xlu0 %881 }
 0xc36   :  { %v884_v50 = vmul.f32 0.03125, %v882_v49  ;;  %v887_v51 = vmul.f32 %v885_v48, %v885_v48 }
 0xc38   :  { %v886_v52 = vsub.f32 %v874_v46, %v884_v50  ;;  %v889_v53 = vsel %vm162_vm8, %v887_v51, 0.0 }
 0xc39   :  { %890 = vadd.xlane.f32.xlu0 %v889_v53  ;;  %v2021_v53 = vld [vmem:[%s2525_s4 + $0x10] sm:$0xff]  }
 0xc3a   :  { %v888_v56 = vmul.f32 %v886_v52, %v886_v52 }
 0xc3c   :  { %v892_v57 = vsel %vm162_vm8, %v888_v56, 0.0 }
 0xc3d   :  { %893 = vadd.xlane.f32.xlu0 %v892_v57 }
 0xcc6   :  { %v891_v60 = vpop.xlane.xlu0 %890 }
 0xcc7   :  { %v895_v61 = vmul.f32 0.03125, %v891_v60 }
 0xcc9   :  { %v897_v62 = vadd.f32 1e-12, %v895_v61 }
 0xcca   :  { %v894_v63 = vpop.xlane.xlu0 %893 }
 0xccb   :  { %2057 = vrsqrt.f32 %v897_v62  ;;  %v896_v1 = vmul.f32 0.03125, %v894_v63 }
 0xccd   :  { %v898_v3 = vadd.f32 1e-12, %v896_v1 }
 0xccf   :  { %2059 = vrsqrt.f32 %v898_v3 }
 0xcd5   :  { %v2058_v4 = vpop.eup %2057 }
 0xcd6   :  { %v901_v5 = vmul.f32 %v2058_v4, %v885_v48 }
 0xcd8   :  { %v907_v8 = vmul.f32 %v1726_v6, %v901_v5 }
 0xcd9   :  { %v2060_v7 = vpop.eup %2059 }
 0xcda   :  { %v902_v9 = vmul.f32 %v2060_v7, %v886_v52  ;;  %v2369_v11 = vadd.f32 %v1727_v10, %v907_v8 }
 0xcdc   :  { %v908_v0 = vmul.f32 %v1726_v6, %v902_v9 }
 0xcde   :  { %v2371_v12 = vadd.f32 %v1727_v10, %v908_v0 }
 0xce0   :  { %v915_v13 = vpack.c.bf16 %v2371_v12, %v2369_v11 }
 0xce2   :  { %1925 = vmatmul.mubr.msk.bf16.vlgmr.msra.gmra.mrb[24].mxu1 %vm162_vm8, %v915_v13 }
 0xce3   :  { %1930 = vmatprep.mubr.msk.bf16.mxu1 %vm2093_vm0, %v2092_v2 }
 0xdb5   :  { %v975_v19 = vpop.f32.mrb[24].mxu1 }
 0xdb6   :  { %v1926_v20 = vpop.f32.mrb[25].mxu1  ;;  %v976_v21 = vadd.f32 %v1732_v16, %v975_v19 }
 0xdb7   :  { %v978_v14 = vpop.f32.mrb[26].mxu1  ;;  %v2022_v20 = vld [vmem:[%s2525_s4 + $0x18] sm:$0xff]  }
 0xdb8   :  { %v979_v22 = vadd.f32 %v1732_v16, %v978_v14  ;;  %v1927_v23 = vpop.f32.mrb[27].mxu1 }
 0xdba   :  { %v2381_v24 = vpack.c.bf16 %v979_v22, %v976_v21 }
 0xdbc   :  { %990 = vrot.lane.b32.xlu0 %v2381_v24, %s2094_s11 }
 0xdc0   :  { %1062 = vrot.lane.b32.xlu0 %v2381_v24, %s2098_s1 }
 0xdc4   :  { %1166 = vrot.lane.b32.xlu0 %v2381_v24, %s2096_s13 }
 0xe2e   :  { %v991_v15 = vpop.permute.xlu0 %990 }
 0xe2f   :  { %v996_v25 = vsel %vm315_vm9, %v991_v15, 0 }
 0xe30   :  { %1929 = vmatpush3.bf16.xpose.msra.mxu1 %v996_v25 }
 0xe31   :  { %1940 = vmatprep.subr.bf16.mxu1 %v2092_v2 }
 0xe32   :  { %v1063_v26 = vpop.permute.xlu0 %1062 }
 0xe33   :  { %1935 = vmatpush3.bf16.msra.mxu0 %v1063_v26 }
 0xe34   :  { %1946 = vmatprep.subr.bf16.mxu0 %v2092_v2 }
 0xe36   :  { %v1167_v52 = vpop.permute.xlu0 %1166 }
 0xe37   :  { %1931 = vmatmul.mubr.msk.bf16.vlgmr.msra.gmra.mrb[28].mxu1 %vm315_vm9, %v2381_v24 }
 0xe38   :  { %1942 = vmatprep.mubr.msk.bf16.mxu1 %vm2093_vm0, %v2092_v2  ;;  %1941 = vmatpush3.bf16.msra.mxu1 %v2021_v53 }
 0xe39   :  { %1952 = vmatprep.subr.bf16.mxu1 %v2092_v2 }
 0xf0a   :  { %v1032_v27 = vpop.f32.mrb[28].mxu1 }
 0xf0b   :  { %v1033_v28 = vadd.f32 %v1032_v27, %v2258_v17  ;;  %v1932_v29 = vpop.f32.mrb[29].mxu1 }
 0xf0c   :  { %v1035_v30 = vpop.f32.mrb[30].mxu1 }
 0xf0d   :  { %v1036_v31 = vadd.f32 %v1035_v30, %v2260_v18  ;;  %v1933_v32 = vpop.f32.mrb[31].mxu1  ;;  %v1039_v33 = vsel %vm315_vm9, %v1033_v28, -inf }
 0xf0e   :  { %1040 = vmax.xlane.f32.xlu1 %v1039_v33 }
 0xf0f   :  { %v1042_v34 = vsel %vm315_vm9, %v1036_v31, -inf }
 0xf12   :  { %1043 = vmax.xlane.f32.xlu1 %v1042_v34 }
 0xf9b   :  { %v1041_v35 = vpop.xlane.xlu1 %1040 }
 0xf9c   :  { %v1045_v36 = vsub.f32 %v1033_v28, %v1041_v35 }
 0xf9e   :  { %v1047_v37 = vmul.f32 1.442695, %v1045_v36  ;;  %v1744_v36 = vld [vmem:[%s2523_s7 + $0x11] ss:$0 sm:$0xff] }
 0xf9f   :  { %v1044_v38 = vpop.xlane.xlu1 %1043 }
 0xfa0   :  { %2061 = vpow2.f32 %v1047_v37  ;;  %v1046_v39 = vsub.f32 %v1036_v31, %v1044_v38 }
 0xfa2   :  { %v1049_v40 = vmul.f32 1.442695, %v1046_v39 }
 0xfa4   :  { %2063 = vpow2.f32 %v1049_v40 }
 0xfaa   :  { %v2062_v41 = vpop.eup %2061 }
 0xfab   :  { %v1051_v42 = vsel %vm315_vm9, %v2062_v41, 0.0 }
 0xfac   :  { %1052 = vadd.xlane.f32.xlu1 %v1051_v42 }
 0xfae   :  { %v2064_v43 = vpop.eup %2063 }
 0xfaf   :  { %v1054_v44 = vsel %vm315_vm9, %v2064_v43, 0.0 }
 0xfb0   :  { %1055 = vadd.xlane.f32.xlu1 %v1054_v44 }
 0xfc1   :  { %1168 = vrot.lane.b32.xlu1 %v2381_v24, %s2095_s12  ;;  %s2100_s12 = smov 32  }
0x1039   :  { %v1053_v45 = vpop.xlane.xlu1 %1052 }
0x103a   :  { %2065 = vrcp.f32 %v1053_v45 }
0x103d   :  { %v1056_v46 = vpop.xlane.xlu1 %1055 }
0x103e   :  { %2067 = vrcp.f32 %v1056_v46 }
0x1041   :  { %v1169_v49 = vpop.permute.xlu1 %1168 }
0x1042   :  { %v1174_v51 = vsel %vm315_vm9, %v1169_v49, 0 }
0x1044   :  { %v2066_v47 = vpop.eup %2065 }
0x1045   :  { %v1058_v55 = vmul.f32 %v2066_v47, %v2062_v41 }
0x1048   :  { %v2068_v54 = vpop.eup %2067 }
0x1049   :  { %v1060_v48 = vmul.f32 %v2068_v54, %v2064_v43 }
0x104b   :  { %v1061_v50 = vpack.c.bf16 %v1060_v48, %v1058_v55 }
0x104d   :  { %1937 = vmatmul.mubr.msk.bf16.vlgmr.msra.gmra.mrb[16].mxu0 %vm315_vm9, %v1061_v50 }
0x104e   :  { %1947 = vmatpush3.bf16.xpose.msra.mxu0 %v1174_v51  ;;  %1948 = vmatprep.mubr.msk.bf16.mxu0 %vm2093_vm0, %v2092_v2 }
0x104f   :  { %1958 = vmatprep.subr.bf16.mxu0 %v2092_v2 }
0x1055   :  { %1949 = vmatmul.mubr.msk.bf16.vlgmr.msra.gmra.mrb[20].mxu0 %vm315_vm9, %v1167_v52 }
0x1056   :  { %1960 = vmatprep.mubr.msk.bf16.mxu0 %vm2093_vm0, %v2092_v2  ;;  %1959 = vmatpush3.bf16.msra.mxu0 %v2022_v20  ;;  %v2028_v20 = vld [vmem:[%s2527_s6 + $0x38] sm:$0xff]  }
0x1057   :  { %1972 = vmatprep.subr.bf16.mxu0 %v2092_v2 }
0x1120   :  { %v1102_v56 = vpop.f32.mrb[16].mxu0 }
0x1121   :  { %v1938_v57 = vpop.f32.mrb[17].mxu0 }
0x1122   :  { %v1105_v58 = vpop.f32.mrb[18].mxu0 }
0x1123   :  { %v1109_v59 = vpack.c.bf16 %v1105_v58, %v1102_v56  ;;  %v1939_v60 = vpop.f32.mrb[19].mxu0  ;;  %v2024_v58 = vld [vmem:[%s2526_s5 + $0x18] sm:$0xff]  }
0x1125   :  { %1943 = vmatmul.mubr.msk.bf16.vlgmr.msra.gmra.mrb[32].mxu1 %vm315_vm9, %v1109_v59 }
0x1126   :  { %1954 = vmatprep.mubr.msk.bf16.mxu1 %vm2093_vm0, %v2092_v2 }
0x1128   :  { %v1210_v61 = vpop.f32.mrb[20].mxu0 }
0x1129   :  { %v1211_v62 = vadd.f32 %v1210_v61, %v2258_v17  ;;  %v1950_v63 = vpop.f32.mrb[21].mxu0 }
0x112a   :  { %v1213_v1 = vpop.f32.mrb[22].mxu0 }
0x112b   :  { %v1214_v3 = vadd.f32 %v1213_v1, %v2260_v18  ;;  %v1951_v4 = vpop.f32.mrb[23].mxu0  ;;  %v1217_v5 = vsel %vm315_vm9, %v1211_v62, -inf }
0x112c   :  { %1218 = vmax.xlane.f32.xlu0 %v1217_v5  ;;  %v1749_v5 = vld [vmem:[%s2523_s7 + $0x12] ss:$0 sm:$0xff] }
0x112d   :  { %v1220_v6 = vsel %vm315_vm9, %v1214_v3, -inf }
0x112e   :  { %1221 = vmax.xlane.f32.xlu1 %v1220_v6 }
0x11b9   :  { %v1219_v7 = vpop.xlane.xlu0 %1218 }
0x11ba   :  { %v1223_v8 = vsub.f32 %v1211_v62, %v1219_v7 }
0x11bb   :  { %v1222_v9 = vpop.xlane.xlu1 %1221 }
0x11bc   :  { %v1225_v10 = vmul.f32 1.442695, %v1223_v8  ;;  %v1224_v0 = vsub.f32 %v1214_v3, %v1222_v9  ;;  %v1750_v9 = vld [vmem:[%s2523_s7 + $0x13] ss:$0 sm:$0xff] }
0x11be   :  { %2069 = vpow2.f32 %v1225_v10  ;;  %v1227_v13 = vmul.f32 1.442695, %v1224_v0 }
0x11c0   :  { %2071 = vpow2.f32 %v1227_v13 }
0x11c8   :  { %v2070_v17 = vpop.eup %2069 }
0x11c9   :  { %v1229_v16 = vsel %vm315_vm9, %v2070_v17, 0.0 }
0x11ca   :  { %v2072_v19 = vpop.eup %2071  ;;  %1230 = vadd.xlane.f32.xlu0 %v1229_v16  ;;  %v2025_v16 = vld [vmem:[%s2527_s6 + $0x20] sm:$0xff]  }
0x11cb   :  { %v1232_v18 = vsel %vm315_vm9, %v2072_v19, 0.0 }
0x11ce   :  { %1233 = vadd.xlane.f32.xlu0 %v1232_v18  ;;  %v2027_v18 = vld [vmem:[%s2527_s6 + $0x30] sm:$0xff]  }
0x11e4   :  { %1240 = vrot.lane.b32.xlu0 %v2381_v24, %s2099_s15 }
0x11f8   :  { %v1153_v14 = vpop.f32.mrb[32].mxu1 }
0x11f9   :  { %v1944_v21 = vpop.f32.mrb[33].mxu1  ;;  %v1164_v37 = vadd.f32 %v1744_v36, %v1153_v14  ;;  %v1755_v14 = vld [vmem:[%s2523_s7 + $0x14] ss:$0 sm:$0xff] }
0x11fa   :  { %v1156_v22 = vpop.f32.mrb[34].mxu1 }
0x11fb   :  { %v1945_v23 = vpop.f32.mrb[35].mxu1  ;;  %v1165_v39 = vadd.f32 %v1744_v36, %v1156_v22 }
0x1257   :  { %v1231_v15 = vpop.xlane.xlu0 %1230 }
0x1258   :  { %2073 = vrcp.f32 %v1231_v15 }
0x125b   :  { %v1234_v25 = vpop.xlane.xlu0 %1233 }
0x125c   :  { %2075 = vrcp.f32 %v1234_v25 }
0x125f   :  { %v1241_v26 = vpop.permute.xlu0 %1240 }
0x1260   :  { %1953 = vmatpush3.bf16.msra.mxu1 %v1241_v26 }
0x1261   :  { %1964 = vmatprep.subr.bf16.mxu1 %v2092_v2 }
0x1262   :  { %v2074_v24 = vpop.eup %2073 }
0x1263   :  { %v1236_v28 = vmul.f32 %v2074_v24, %v2070_v17 }
0x1266   :  { %v2076_v27 = vpop.eup %2075 }
0x1267   :  { %v1238_v29 = vmul.f32 %v2076_v27, %v2072_v19  ;;  %v2026_v19 = vld [vmem:[%s2527_s6 + $0x28] sm:$0xff]  }
0x1269   :  { %v1239_v30 = vpack.c.bf16 %v1238_v29, %v1236_v28 }
0x126b   :  { %1955 = vmatmul.mubr.msk.bf16.vlgmr.msra.gmra.mrb[36].mxu1 %vm315_vm9, %v1239_v30 }
0x126c   :  { %1968 = vmatprep.mubr.msk.bf16.mxu1 %vm2093_vm0, %v2092_v2 }
0x133e   :  { %v1280_v31 = vpop.f32.mrb[36].mxu1 }
0x133f   :  { %v1956_v32 = vpop.f32.mrb[37].mxu1 }
0x1340   :  { %v1283_v33 = vpop.f32.mrb[38].mxu1 }
0x1341   :  { %v1287_v34 = vpack.c.bf16 %v1283_v33, %v1280_v31  ;;  %v1957_v35 = vpop.f32.mrb[39].mxu1 }
0x1343   :  { %1961 = vmatmul.mubr.msk.bf16.vlgmr.msra.gmra.mrb[24].mxu0 %vm315_vm9, %v1287_v34 }
0x1344   :  { %1980 = vmatprep.mubr.msk.bf16.mxu0 %vm2093_vm0, %v2092_v2  ;;  %1973 = vmatpush3.bf16.msra.mxu0 %v2025_v16 }
0x1345   :  { %1974 = vmatprep.subr.bf16.mxu0 %v2092_v2 }
0x1348   :  { %1975 = vmatpush3.bf16.msra.mxu0 %v2026_v19 }
0x1349   :  { %1976 = vmatprep.subr.bf16.mxu0 %v2092_v2 }
0x134c   :  { %1977 = vmatpush3.bf16.msra.mxu0 %v2027_v18 }
0x134d   :  { %1978 = vmatprep.subr.bf16.mxu0 %v2092_v2 }
0x1350   :  { %1979 = vmatpush3.bf16.msra.mxu0 %v2028_v20 }
0x1416   :  { %v1331_v38 = vpop.f32.mrb[24].mxu0 }
0x1417   :  { %v1338_v40 = vadd.f32 %v1331_v38, %v1164_v37  ;;  %v1962_v41 = vpop.f32.mrb[25].mxu0 }
0x1418   :  { %v1334_v42 = vpop.f32.mrb[26].mxu0 }
0x1419   :  { %v1339_v43 = vadd.f32 %v1334_v42, %v1165_v39  ;;  %v1963_v44 = vpop.f32.mrb[27].mxu0  ;;  %v1340_v45 = vadd.f32 %v1338_v40, %v2369_v11 }
0x141b   :  { %v1344_v46 = vsel %vm162_vm8, %v1340_v45, 0.0  ;;  %v1341_v47 = vadd.f32 %v1339_v43, %v2371_v12  ;;  %v2023_v12 = vld [vmem:[%s2526_s5 + $0x10] sm:$0xff]  }
0x141c   :  { %1345 = vadd.xlane.f32.xlu1 %v1344_v46  ;;  %1965 = vmatpush3.bf16.msra.mxu1 %v2023_v12 }
0x141d   :  { %v1347_v54 = vsel %vm162_vm8, %v1341_v47, 0.0  ;;  %1966 = vmatprep.subr.bf16.mxu1 %v2092_v2 }
0x1420   :  { %1348 = vadd.xlane.f32.xlu1 %v1347_v54  ;;  %1967 = vmatpush3.bf16.msra.mxu1 %v2024_v58 }
0x1421   :  { %1984 = vmatprep.subr.bf16.mxu1 %v2092_v2 }
0x14a9   :  { %v1346_v55 = vpop.xlane.xlu1 %1345 }
0x14aa   :  { %v1350_v48 = vmul.f32 0.03125, %v1346_v55 }
0x14ac   :  { %v1352_v49 = vsub.f32 %v1340_v45, %v1350_v48  ;;  %v1767_v45 = vld [vmem:[%s2523_s7 + $0x15] ss:$0 sm:$0xff] }
0x14ad   :  { %v1349_v50 = vpop.xlane.xlu1 %1348 }
0x14ae   :  { %v1351_v51 = vmul.f32 0.03125, %v1349_v50  ;;  %v1354_v52 = vmul.f32 %v1352_v49, %v1352_v49 }
0x14b0   :  { %v1353_v53 = vsub.f32 %v1341_v47, %v1351_v51  ;;  %v1356_v56 = vsel %vm162_vm8, %v1354_v52, 0.0 }
0x14b1   :  { %1357 = vadd.xlane.f32.xlu1 %v1356_v56 }
0x14b2   :  { %v1355_v57 = vmul.f32 %v1353_v53, %v1353_v53 }
0x14b4   :  { %v1359_v11 = vsel %vm162_vm8, %v1355_v57, 0.0 }
0x14b5   :  { %1360 = vadd.xlane.f32.xlu1 %v1359_v11 }
0x153e   :  { %v1358_v59 = vpop.xlane.xlu1 %1357 }
0x153f   :  { %v1362_v60 = vmul.f32 0.03125, %v1358_v59 }
0x1541   :  { %v1364_v61 = vadd.f32 1e-12, %v1362_v60 }
0x1542   :  { %v1361_v62 = vpop.xlane.xlu1 %1360 }
0x1543   :  { %2077 = vrsqrt.f32 %v1364_v61  ;;  %v1363_v63 = vmul.f32 0.03125, %v1361_v62 }
0x1545   :  { %v1365_v1 = vadd.f32 1e-12, %v1363_v63 }
0x1547   :  { %2079 = vrsqrt.f32 %v1365_v1 }
0x154d   :  { %v2078_v3 = vpop.eup %2077 }
0x154e   :  { %v1368_v4 = vmul.f32 %v2078_v3, %v1352_v49 }
0x1550   :  { %v1374_v7 = vmul.f32 %v1749_v5, %v1368_v4 }
0x1551   :  { %v2080_v6 = vpop.eup %2079 }
0x1552   :  { %v1369_v8 = vmul.f32 %v2080_v6, %v1353_v53  ;;  %v1380_v0 = vadd.f32 %v1750_v9, %v1374_v7 }
0x1554   :  { %v1375_v10 = vmul.f32 %v1749_v5, %v1369_v8 }
0x1556   :  { %v1381_v13 = vadd.f32 %v1750_v9, %v1375_v10  ;;  %v1773_v9 = vld [vmem:[%s2523_s7 + $0x16] ss:$0 sm:$0xff] }
0x1558   :  { %v1382_v17 = vpack.c.bf16 %v1381_v13, %v1380_v0 }
0x155a   :  { %1969 = vmatmul.mubr.msk.bf16.vlgmr.msra.gmra.mrb[40].mxu1 %vm162_vm8, %v1382_v17 }
0x155b   :  { %1986 = vmatprep.mubr.msk.bf16.mxu1 %vm2093_vm0, %v2092_v2  ;;  %vm1599_vm0 = vcmask 254976   ;;  %v1777_v2 = vld [vmem:[%s2523_s7 + $0x4] ss:$0 sm:$0xff] }
0x162d   :  { %v1442_v21 = vpop.f32.mrb[40].mxu1 }
0x162e   :  { %v1443_v22 = vadd.f32 %v1755_v14, %v1442_v21  ;;  %v1970_v23 = vpop.f32.mrb[41].mxu1 }
0x162f   :  { %v1445_v15 = vpop.f32.mrb[42].mxu1 }
0x1630   :  { %v1451_v25 = vmul.f32 0.044715, %v1443_v22  ;;  %v1446_v26 = vadd.f32 %v1755_v14, %v1445_v15  ;;  %v1971_v24 = vpop.f32.mrb[43].mxu1  ;;  %v1449_v39 = vmul.f32 0.5, %v1443_v22 }
0x1632   :  { %v1453_v27 = vmul.f32 %v1451_v25, %v1443_v22  ;;  %v1452_v28 = vmul.f32 0.044715, %v1446_v26  ;;  %v1450_v40 = vmul.f32 0.5, %v1446_v26 }
0x1634   :  { %v1455_v29 = vmul.f32 %v1453_v27, %v1443_v22  ;;  %v1454_v30 = vmul.f32 %v1452_v28, %v1446_v26  ;;  %v1623_v27 = vld [vmem:[%s2523_s7 + $0x5] sm:$0x7] }
0x1635   :  { %v1625_v28 = vpack.c.bf16 %v1623_v27, %v1623_v27 }
0x1636   :  { %v1457_v31 = vadd.f32 %v1455_v29, %v1443_v22  ;;  %v1456_v32 = vmul.f32 %v1454_v30, %v1446_v26 }
0x1637   :  { %v1635_v29 = vsel %vm162_vm8, %v1625_v28, 0 }
0x1638   :  { %v1459_v33 = vmul.f32 0.7978846, %v1457_v31  ;;  %v1458_v34 = vadd.f32 %v1456_v32, %v1446_v26  ;;  %1985 = vmatpush3.bf16.xpose.msra.mxu1 %v1635_v29 }
0x163a   :  { %2081 = vtanh.f32 %v1459_v33  ;;  %v1460_v35 = vmul.f32 0.7978846, %v1458_v34  ;;  %v1775_v34 = vld [vmem:[%s2523_s7 + $0x2] ss:$0 sm:$0xff] }
0x163c   :  { %2083 = vtanh.f32 %v1460_v35 }
0x1644   :  { %v2082_v36 = vpop.eup %2081 }
0x1645   :  { %v1463_v37 = vadd.f32 1.0, %v2082_v36  ;;  %v1776_v36 = vld [vmem:[%s2523_s7 + $0x3] ss:$0 sm:$0xff] }
0x1646   :  { %v2084_v38 = vpop.eup %2083 }
0x1647   :  { %v1464_v41 = vadd.f32 1.0, %v2084_v38  ;;  %v1465_v42 = vmul.f32 %v1463_v37, %v1449_v39 }
0x1649   :  { %v1466_v43 = vmul.f32 %v1464_v41, %v1450_v40 }
0x164b   :  { %v1467_v44 = vpack.c.bf16 %v1466_v43, %v1465_v42 }
0x164d   :  { %1981 = vmatmul.mubr.msk.bf16.vlgmr.msra.gmra.mrb[28].mxu0 %vm828_vm14, %v1467_v44 }
0x1720   :  { %v1543_v46 = vpop.f32.mrb[28].mxu0 }
0x1721   :  { %v1544_v47 = vadd.f32 %v1767_v45, %v1543_v46  ;;  %v1982_v54 = vpop.f32.mrb[29].mxu0 }
0x1722   :  { %v1546_v55 = vpop.f32.mrb[30].mxu0 }
0x1723   :  { %v1547_v48 = vadd.f32 %v1767_v45, %v1546_v55  ;;  %v1983_v49 = vpop.f32.mrb[31].mxu0  ;;  %v1550_v50 = vadd.f32 %v1544_v47, %v1380_v0  ;;  %v1774_v0 = vld [vmem:[%s2523_s7 + $0x17] ss:$0 sm:$0xff] }
0x1725   :  { %v1554_v51 = vsel %vm162_vm8, %v1550_v50, 0.0  ;;  %v1551_v52 = vadd.f32 %v1547_v48, %v1381_v13 }
0x1726   :  { %1555 = vadd.xlane.f32.xlu1 %v1554_v51 }
0x1727   :  { %v1557_v53 = vsel %vm162_vm8, %v1551_v52, 0.0 }
0x1728   :  { %1558 = vadd.xlane.f32.xlu0 %v1557_v53 }
0x17b3   :  { %v1556_v56 = vpop.xlane.xlu1 %1555 }
0x17b4   :  { %v1560_v57 = vmul.f32 0.03125, %v1556_v56 }
0x17b5   :  { %v1559_v11 = vpop.xlane.xlu0 %1558 }
0x17b6   :  { %v1561_v12 = vmul.f32 0.03125, %v1559_v11  ;;  %v1562_v58 = vsub.f32 %v1550_v50, %v1560_v57 }
0x17b8   :  { %v1563_v59 = vsub.f32 %v1551_v52, %v1561_v12  ;;  %v1564_v62 = vmul.f32 %v1562_v58, %v1562_v58 }
0x17ba   :  { %v1565_v60 = vmul.f32 %v1563_v59, %v1563_v59  ;;  %v1566_v63 = vsel %vm162_vm8, %v1564_v62, 0.0 }
0x17bc   :  { %v1569_v61 = vsel %vm162_vm8, %v1565_v60, 0.0 }
0x17bd   :  { %1570 = vadd.xlane.f32.xlu1 %v1569_v61 }
0x17c1   :  { %1567 = vadd.xlane.f32.xlu1 %v1566_v63 }
0x184a   :  { %v1571_v1 = vpop.xlane.xlu1 %1570 }
0x184b   :  { %v1573_v3 = vmul.f32 0.03125, %v1571_v1 }
0x184d   :  { %v1575_v4 = vadd.f32 1e-12, %v1573_v3 }
0x184e   :  { %v1568_v5 = vpop.xlane.xlu1 %1567 }
0x184f   :  { %2085 = vrsqrt.f32 %v1575_v4  ;;  %v1572_v6 = vmul.f32 0.03125, %v1568_v5 }
0x1851   :  { %v1574_v7 = vadd.f32 1e-12, %v1572_v6 }
0x1853   :  { %2087 = vrsqrt.f32 %v1574_v7 }
0x1859   :  { %v2086_v8 = vpop.eup %2085 }
0x185a   :  { %v1579_v10 = vmul.f32 %v2086_v8, %v1563_v59 }
0x185c   :  { %v1585_v13 = vmul.f32 %v1773_v9, %v1579_v10 }
0x185d   :  { %v2088_v17 = vpop.eup %2087 }
0x185e   :  { %v1578_v16 = vmul.f32 %v2088_v17, %v1562_v58  ;;  %v1591_v19 = vadd.f32 %v1774_v0, %v1585_v13 }
0x1860   :  { %v1584_v18 = vmul.f32 %v1773_v9, %v1578_v16  ;;  %v1593_v14 = vrot.slane %v1591_v19, 7 }
0x1862   :  { %v1590_v20 = vadd.f32 %v1774_v0, %v1584_v18 }
0x1864   :  { %v1596_v21 = vsel %vm1595_vm15, %v1590_v20, %v1593_v14 }
0x1865   :  { %v1600_v22 = vsel %vm1599_vm0, %v1596_v21, 0.0 }
0x1866   :  { %1601 = vadd.xlane.f32.xlu1 %v1600_v22 }
0x18f3   :  { %v1602_v23 = vpop.xlane.xlu1 %1601 }
0x18f4   :  { %v1603_v15 = vmul.f32 0.03125, %v1602_v23 }
0x18f6   :  { %v1604_v25 = vsub.f32 %v1596_v21, %v1603_v15 }
0x18f8   :  { %v1605_v26 = vmul.f32 %v1604_v25, %v1604_v25 }
0x18fa   :  { %v1606_v24 = vsel %vm1599_vm0, %v1605_v26, 0.0 }
0x18fb   :  { %1607 = vadd.xlane.f32.xlu1 %v1606_v24 }
0x190c   :  { %1681 = vrot.lane.b32.xlu1 %v1596_v21, %s2100_s12 }
0x1988   :  { %v1608_v30 = vpop.xlane.xlu1 %1607 }
0x1989   :  { %v1609_v31 = vmul.f32 0.03125, %v1608_v30 }
0x198b   :  { %v1610_v32 = vadd.f32 1e-05, %v1609_v31 }
0x198c   :  { %v1682_v44 = vpop.permute.xlu1 %1681 }
0x198d   :  { %2089 = vrsqrt.f32 %v1610_v32 }
0x1997   :  { %v2090_v33 = vpop.eup %2089 }
0x1998   :  { %v1612_v35 = vmul.f32 %v2090_v33, %v1604_v25 }
0x199a   :  { %v1617_v37 = vmul.f32 %v1775_v34, %v1612_v35 }
0x199c   :  { %v1622_v38 = vadd.f32 %v1776_v36, %v1617_v37 }
0x199e   :  { %v1624_v39 = vpack.c.bf16 %v1622_v38, %v1622_v38 }
0x19a0   :  { %1987 = vmatmul.mubr.msk.bf16.vlgmr.msra.gmra.mrb[44].mxu1 %vm162_vm8, %v1624_v39 }
0x1a73   :  { %v1671_v40 = vpop.f32.mrb[44].mxu1 }
0x1a74   :  { %v1672_v41 = vadd.f32 %v1777_v2, %v1671_v40  ;;  %v1988_v42 = vpop.f32.mrb[45].mxu1 }
0x1a75   :  { %v1674_v43 = vpop.f32.mrb[46].mxu1 }
0x1a76   :  { %1679 = vst.msk [vmem:[%s2528_s8] sm:$0x3] %vm1678_vm1, %v1672_v41  ;;  %v1989_v45 = vpop.f32.mrb[47].mxu1 }
0x1a77   :  { %1685 = vst.msk [vmem:[%s2528_s8] sm:$0x3] %vm1684_vm2, %v1682_v44 }

</bundles_post_ra>
